<compile_context>
chip_gen: v7x
topology: tpu7x:2x2x1
jax: 0.10.0
libtpu: 0.0.40
codegen_flags: <defaults>
</compile_context>

<pallas_src>
import functools

import jax
import jax.numpy as jnp
from jax.experimental import pallas as pl
from jax.experimental.pallas import tpu as pltpu

_PAD = 128     # lane block for the fused init-linear output (h0 | c0 | x)
_SEG = 256     # lane block for each 200-wide segment of the hypernetwork E


def _e_pad_dim(data_size):
    # padded layout: [m1 row 0 | ... | m1 row ds-1 | m2 | b1 | b2]
    # every 200-wide segment occupies a 256-lane block; b2 a final 128 block.
    return _SEG * data_size + 2 * _SEG + 128


# ----------------------------------------------------------------------------
# Fused forward kernel
# ----------------------------------------------------------------------------
def _rnn_fused_kernel(x_ref, z_ref, w_init_ref, b_init_ref,
                      w_ih_ref, w_hh_ref, b_lstm_ref,
                      w_d1_ref, b_d1_ref, w_d2_ref, b_d2_ref,
                      e_ref, hc_ref, pred_ref, m1_ref,
                      *, latent_dim, num_rnn_layer, data_size):
    H = latent_dim
    L = num_rnn_layer

    # --- fused init linears (lane padded to 3x128): tanh(z@[Wh|Wc|Win]+b) ---
    init = jnp.tanh(
        jnp.dot(z_ref[...], w_init_ref[...], preferred_element_type=jnp.float32)
        + b_init_ref[...])                        # (1, 3*128)
    h0 = init[:, 0 * _PAD:1 * _PAD]               # (1,128); lanes >= H are 0
    c0 = init[:, 1 * _PAD:1 * _PAD + H]           # (1,H)
    x = init[:, 2 * _PAD:2 * _PAD + H]            # (1,H)

    # --- hoisted recurrent contribution for ALL layers (+ folded biases) ---
    # W_hh rows H..127 are zero-padded, so the padded h0 is safe to use.
    hh_all = (jnp.dot(h0, w_hh_ref[...], preferred_element_type=jnp.float32)
              + b_lstm_ref[...])                  # (1, L*4H)

    # --- LSTM, seq_len == 1; every layer starts from the same (h0, c0) ------
    h_list, c_list = [], []
    for l in range(L):
        gates = (jnp.dot(x, w_ih_ref[l], preferred_element_type=jnp.float32)
                 + hh_all[:, l * 4 * H:(l + 1) * 4 * H])
        # gate columns pre-reordered to (i, f, o | g)
        sig = jax.nn.sigmoid(gates[:, :3 * H])
        i_g = sig[:, 0 * H:1 * H]
        f_g = sig[:, 1 * H:2 * H]
        o_g = sig[:, 2 * H:3 * H]
        g_g = jnp.tanh(gates[:, 3 * H:4 * H])
        c_new = f_g * c0 + i_g * g_g
        h_new = o_g * jnp.tanh(c_new)
        h_list.append(h_new)
        c_list.append(c_new)
        x = h_new                                 # input of the next layer

    # single lane-dense store of all h_n / c_n  (B, 2*L*H)
    hc_ref[...] = jnp.concatenate(h_list + c_list, axis=-1).astype(hc_ref.dtype)

    # --- lin_transform_down: Linear -> ReLU -> Linear (padded E layout) -----
    t = jnp.maximum(
        jnp.dot(x, w_d1_ref[...], preferred_element_type=jnp.float32)
        + b_d1_ref[...], 0.0)
    E = (jnp.dot(t, w_d2_ref[...], preferred_element_type=jnp.float32)
         + b_d2_ref[...])                         # (1, E_pad_dim); pad cols 0
    e_ref[...] = E.astype(e_ref.dtype)

    # --- constructed MLP on X (nn_construction + prediction loop) -----------
    # scatter the data_size lane-aligned m1 segments into the (ds,256) scratch
    for d in range(data_size):
        m1_ref[d:d + 1, :] = E[:, _SEG * d:_SEG * (d + 1)]
    m2_off = _SEG * data_size
    b1 = E[:, m2_off + _SEG:m2_off + 2 * _SEG]    # (1,256), pad lanes are 0
    # layer 1 on the MXU: relu(X @ m1 + b1)
    p1 = jnp.maximum(
        jnp.dot(x_ref[...], m1_ref[...], preferred_element_type=jnp.float32)
        + b1, 0.0)                                # (N,256), pad lanes are 0
    # layer 2: sigmoid(p1 @ m2 + b2) via lane reduction (no transpose)
    m2 = E[:, m2_off:m2_off + _SEG]               # (1,256), pad lanes are 0
    b2 = E[:, m2_off + 2 * _SEG:m2_off + 2 * _SEG + 1]    # (1,1)
    p2 = jnp.sum(p1 * m2, axis=-1, keepdims=True) + b2    # (N,1)
    # TODO(synk): for large N emit pred lane-dense ((1,N) or lane-padded)
    # instead of (N,1) to avoid per-row masked stores; negligible at N=8.
    pred_ref[...] = jax.nn.sigmoid(p2).astype(pred_ref.dtype)


# ----------------------------------------------------------------------------
# Wrapper
# ----------------------------------------------------------------------------
def rnn_forward(params, X, z, *, data_size, latent_dim, num_rnn_layer):
    """Returns (E, (h_n, c_n), pred) matching RNN.forward(X, z) (E/hidden None)."""
    N = X.shape[0]
    B = z.shape[0]
    # torch.mm in the constructed-MLP path requires a single z row.
    assert B == 1, "RNN constructed-MLP semantics require B == 1"
    L, H = num_rnn_layer, latent_dim
    E_pad = _e_pad_dim(data_size)

    kernel = functools.partial(
        _rnn_fused_kernel, latent_dim=H, num_rnn_layer=L, data_size=data_size)

    out_shape = (
        jax.ShapeDtypeStruct((B, E_pad), jnp.float32),        # padded E
        jax.ShapeDtypeStruct((B, 2 * L * H), jnp.float32),    # [h_n | c_n]
        jax.ShapeDtypeStruct((N, 1), jnp.float32),            # pred
    )

    # TODO(synk): if N grows large, tile N as a "parallel" grid axis (megacore
    # on v7x + BlockSpec pipelining of X/pred); at N=8 a single grid-less
    # invocation with everything VMEM-resident is optimal.
    E_p, hc, pred = pl.pallas_call(
        kernel,
        out_shape=out_shape,
        scratch_shapes=[pltpu.VMEM((data_size, _SEG), jnp.float32)],
    )(X, z,
      params["w_init"], params["b_init"],
      params["w_ih"], params["w_hh"], params["b_lstm"],
      params["w_d1"], params["b_d1"], params["w_d2"], params["b_d2"])

    # un-pad E back to the module's dense layout (plain XLA slicing)
    segs = [E_p[:, _SEG * d:_SEG * d + 200] for d in range(data_size)]
    segs.append(E_p[:, _SEG * data_size:_SEG * data_size + 200])               # m2
    segs.append(E_p[:, _SEG * (data_size + 1):_SEG * (data_size + 1) + 200])   # b1
    segs.append(E_p[:, _SEG * (data_size + 2):_SEG * (data_size + 2) + 1])     # b2
    E = jnp.concatenate(segs, axis=-1)

    h_n = hc[:, :L * H].reshape(B, L, H).transpose(1, 0, 2)    # (L, B, H)
    c_n = hc[:, L * H:].reshape(B, L, H).transpose(1, 0, 2)    # (L, B, H)
    return E, (h_n, c_n), pred


# ----------------------------------------------------------------------------
# Parameter construction: raw (PyTorch-style) params + packing for the kernel
# ----------------------------------------------------------------------------
def init_raw_params(key, *, data_size, noise_dim, latent_dim, hidden_dim,
                    num_rnn_layer):
    E_dim = data_size * 200 + 200 + 200 + 1
    keys = jax.random.split(key, 5 + num_rnn_layer)

    def linear(k, fan_in, fan_out):
        kw, kb = jax.random.split(k)
        bound = 1.0 / float(fan_in) ** 0.5
        w = jax.random.uniform(kw, (fan_in, fan_out), jnp.float32, -bound, bound)
        b = jax.random.uniform(kb, (1, fan_out), jnp.float32, -bound, bound)
        return w, b

    w_h, b_h = linear(keys[0], noise_dim, latent_dim)
    w_c, b_c = linear(keys[1], noise_dim, latent_dim)
    w_in, b_in = linear(keys[2], noise_dim, latent_dim)
    w_d1, b_d1 = linear(keys[3], latent_dim, hidden_dim)
    w_d2, b_d2 = linear(keys[4], hidden_dim, E_dim)

    w_ih, w_hh, b_ih, b_hh = [], [], [], []
    for l in range(num_rnn_layer):
        k1, k2, k3, k4 = jax.random.split(keys[5 + l], 4)
        bound = 1.0 / float(latent_dim) ** 0.5
        w_ih.append(jax.random.uniform(k1, (latent_dim, 4 * latent_dim),
                                       jnp.float32, -bound, bound))
        w_hh.append(jax.random.uniform(k2, (latent_dim, 4 * latent_dim),
                                       jnp.float32, -bound, bound))
        b_ih.append(jax.random.uniform(k3, (1, 4 * latent_dim),
                                       jnp.float32, -bound, bound))
        b_hh.append(jax.random.uniform(k4, (1, 4 * latent_dim),
                                       jnp.float32, -bound, bound))

    return {"w_h": w_h, "b_h": b_h, "w_c": w_c, "b_c": b_c,
            "w_in": w_in, "b_in": b_in,
            "w_ih": w_ih, "w_hh": w_hh, "b_ih": b_ih, "b_hh": b_hh,
            "w_d1": w_d1, "b_d1": b_d1, "w_d2": w_d2, "b_d2": b_d2}


def pack_params(raw, *, data_size, latent_dim, num_rnn_layer):
    H, L = latent_dim, num_rnn_layer
    assert H <= _PAD and 200 <= _SEG
    noise_dim = raw["w_h"].shape[0]

    def reorder_gates(a):
        # PyTorch gate-column order (i, f, g, o) -> kernel order (i, f, o, g)
        return jnp.concatenate(
            [a[..., 0:H], a[..., H:2 * H], a[..., 3 * H:4 * H],
             a[..., 2 * H:3 * H]], axis=-1)

    # fused init linears, lane padded: [h0 | pad | c0 | pad | x | pad]
    w_init = jnp.zeros((noise_dim, 3 * _PAD), jnp.float32)
    b_init = jnp.zeros((1, 3 * _PAD), jnp.float32)
    for i, (w, b) in enumerate([(raw["w_h"], raw["b_h"]),
                                (raw["w_c"], raw["b_c"]),
                                (raw["w_in"], raw["b_in"])]):
        w_init = w_init.at[:, i * _PAD:i * _PAD + H].set(w)
        b_init = b_init.at[:, i * _PAD:i * _PAD + H].set(b)

    # LSTM: stacked input weights; hoisted recurrent weights (+ folded biases)
    w_ih = jnp.stack([reorder_gates(raw["w_ih"][l]) for l in range(L)], axis=0)
    w_hh = jnp.zeros((_PAD, L * 4 * H), jnp.float32)      # rows H..127 zero
    b_lstm = jnp.zeros((1, L * 4 * H), jnp.float32)
    for l in range(L):
        w_hh = w_hh.at[:H, l * 4 * H:(l + 1) * 4 * H].set(
            reorder_gates(raw["w_hh"][l]))
        b_lstm = b_lstm.at[:, l * 4 * H:(l + 1) * 4 * H].set(
            reorder_gates(raw["b_ih"][l] + raw["b_hh"][l]))

    # lin_transform_down second layer: lane-aligned padded E column layout
    E_pad = _e_pad_dim(data_size)
    ds200 = data_size * 200

    def pad_E_cols(a):
        out = jnp.zeros(a.shape[:-1] + (E_pad,), jnp.float32)
        for d in range(data_size):
            out = out.at[..., _SEG * d:_SEG * d + 200].set(
                a[..., 200 * d:200 * (d + 1)])
        out = out.at[..., _SEG * data_size:_SEG * data_size + 200].set(
            a[..., ds200:ds200 + 200])                                    # m2
        out = out.at[..., _SEG * (data_size + 1):
                     _SEG * (data_size + 1) + 200].set(
            a[..., ds200 + 200:ds200 + 400])                              # b1
        out = out.at[..., _SEG * (data_size + 2):
                     _SEG * (data_size + 2) + 1].set(
            a[..., ds200 + 400:ds200 + 401])                              # b2
        return out

    return {"w_init": w_init, "b_init": b_init,
            "w_ih": w_ih, "w_hh": w_hh, "b_lstm": b_lstm,
            "w_d1": raw["w_d1"], "b_d1": raw["b_d1"],
            "w_d2": pad_E_cols(raw["w_d2"]), "b_d2": pad_E_cols(raw["b_d2"])}


# ----------------------------------------------------------------------------
# Pure-JAX reference (raw params, exact PyTorch semantics) for correctness
# ----------------------------------------------------------------------------
def _ref_forward(raw, X, z, *, data_size, latent_dim, num_rnn_layer):
    H = latent_dim
    h0 = jnp.tanh(z @ raw["w_h"] + raw["b_h"])     # hidden[0][l] = tanh(init_lin_h(z))
    c0 = jnp.tanh(z @ raw["w_c"] + raw["b_c"])     # hidden[1][l] = tanh(init_lin_c(z))
    x = jnp.tanh(z @ raw["w_in"] + raw["b_in"])
    hs, cs = [], []
    for l in range(num_rnn_layer):
        gates = (x @ raw["w_ih"][l] + h0 @ raw["w_hh"][l]
                 + raw["b_ih"][l] + raw["b_hh"][l])
        i_g = jax.nn.sigmoid(gates[:, 0 * H:1 * H])
        f_g = jax.nn.sigmoid(gates[:, 1 * H:2 * H])
        g_g = jnp.tanh(gates[:, 2 * H:3 * H])
        o_g = jax.nn.sigmoid(gates[:, 3 * H:4 * H])
        c_new = f_g * c0 + i_g * g_g
        h_new = o_g * jnp.tanh(c_new)
        hs.append(h_new)
        cs.append(c_new)
        x = h_new
    t = jax.nn.relu(x @ raw["w_d1"] + raw["b_d1"])
    E = t @ raw["w_d2"] + raw["b_d2"]
    m1 = E[:, :data_size * 200].reshape(-1, 200)
    m2 = E[:, data_size * 200:data_size * 200 + 200].reshape(-1, 1)
    b1 = E[:, data_size * 200 + 200:data_size * 200 + 400]
    b2 = E[:, -1:]
    pred = jax.nn.relu(X @ m1 + b1)
    pred = jax.nn.sigmoid(pred @ m2 + b2)
    return E, (jnp.stack(hs, 0), jnp.stack(cs, 0)), pred


# ----------------------------------------------------------------------------
if __name__ == "__main__":
    data_size = 4
    noise_dim = 32
    latent_dim = 32
    hidden_dim = 64
    num_rnn_layer = 2
    N = 8    # rows of X
    B = 1    # z batch (B=1 required by the torch.mm shapes in the module)

    key = jax.random.PRNGKey(0)
    kp, kx, kz = jax.random.split(key, 3)
    raw = init_raw_params(kp, data_size=data_size, noise_dim=noise_dim,
                          latent_dim=latent_dim, hidden_dim=hidden_dim,
                          num_rnn_layer=num_rnn_layer)
    params = pack_params(raw, data_size=data_size, latent_dim=latent_dim,
                         num_rnn_layer=num_rnn_layer)
    X = jax.random.normal(kx, (N, data_size), jnp.float32)
    z = jax.random.normal(kz, (B, noise_dim), jnp.float32)

    fwd = jax.jit(functools.partial(
        rnn_forward, data_size=data_size, latent_dim=latent_dim,
        num_rnn_layer=num_rnn_layer))

    E, (h_n, c_n), pred = fwd(params, X, z)
    jax.block_until_ready((E, h_n, c_n, pred))

    E_dim = data_size * 200 + 200 + 200 + 1
    assert E.shape == (B, E_dim)
    assert h_n.shape == (num_rnn_layer, B, latent_dim)
    assert c_n.shape == (num_rnn_layer, B, latent_dim)
    assert pred.shape == (N, 1)

    # correctness vs. pure-JAX reference on the raw (unpacked) parameters
    E_r, (h_r, c_r), pred_r = _ref_forward(
        raw, X, z, data_size=data_size, latent_dim=latent_dim,
        num_rnn_layer=num_rnn_layer)
    assert jnp.allclose(E, E_r, atol=1e-3, rtol=1e-3)
    assert jnp.allclose(h_n, h_r, atol=1e-3, rtol=1e-3)
    assert jnp.allclose(c_n, c_r, atol=1e-3, rtol=1e-3)
    assert jnp.allclose(pred, pred_r, atol=1e-3, rtol=1e-3)

    print("KERNEL_OK")
</pallas_src>

<mosaic_0001>
module attributes {stable_mosaic.version = 11 : i64} {
  func.func @_rnn_fused_kernel(%arg0: memref<8x4xf32, #tpu.memory_space<vmem>>, %arg1: memref<1x32xf32, #tpu.memory_space<vmem>>, %arg2: memref<32x384xf32, #tpu.memory_space<vmem>>, %arg3: memref<1x384xf32, #tpu.memory_space<vmem>>, %arg4: memref<2x32x128xf32, #tpu.memory_space<vmem>>, %arg5: memref<128x256xf32, #tpu.memory_space<vmem>>, %arg6: memref<1x256xf32, #tpu.memory_space<vmem>>, %arg7: memref<32x64xf32, #tpu.memory_space<vmem>>, %arg8: memref<1x64xf32, #tpu.memory_space<vmem>>, %arg9: memref<64x1664xf32, #tpu.memory_space<vmem>>, %arg10: memref<1x1664xf32, #tpu.memory_space<vmem>>, %arg11: memref<1x1664xf32, #tpu.memory_space<vmem>>, %arg12: memref<1x128xf32, #tpu.memory_space<vmem>>, %arg13: memref<8x1xf32, #tpu.memory_space<vmem>>, %arg14: memref<4x256xf32, #tpu.memory_space<vmem>>) attributes {dimension_semantics = [], scalar_prefetch = 0 : i64, scratch_operands = 1 : i64, tpu.core_type = #tpu.core_type<tc>} {
    %c0 = arith.constant 0 : index
    %c0_0 = arith.constant 0 : index
    %0 = vector.load %arg1[%c0, %c0_0] : memref<1x32xf32, #tpu.memory_space<vmem>>, vector<1x32xf32>
    %c0_1 = arith.constant 0 : index
    %c0_2 = arith.constant 0 : index
    %1 = vector.load %arg2[%c0_1, %c0_2] : memref<32x384xf32, #tpu.memory_space<vmem>>, vector<32x384xf32>
    %cst = arith.constant dense<0.000000e+00> : vector<1x384xf32>
    %2 = tpu.matmul %0, %1, %cst {dimension_numbers = #tpu.dot_dimension_numbers<[1], [0], [0], [1], [0, 0, 1, 1], [], []>} : vector<1x32xf32>, vector<32x384xf32>, vector<1x384xf32> -> vector<1x384xf32>
    %c0_3 = arith.constant 0 : index
    %c0_4 = arith.constant 0 : index
    %3 = vector.load %arg3[%c0_3, %c0_4] : memref<1x384xf32, #tpu.memory_space<vmem>>, vector<1x384xf32>
    %4 = arith.addf %2, %3 : vector<1x384xf32>
    %5 = math.tanh %4 : vector<1x384xf32>
    %6 = vector.extract_strided_slice %5 {offsets = [0, 0], sizes = [1, 128], strides = [1, 1]} : vector<1x384xf32> to vector<1x128xf32>
    %7 = vector.extract_strided_slice %5 {offsets = [0, 128], sizes = [1, 32], strides = [1, 1]} : vector<1x384xf32> to vector<1x32xf32>
    %8 = vector.extract_strided_slice %5 {offsets = [0, 256], sizes = [1, 32], strides = [1, 1]} : vector<1x384xf32> to vector<1x32xf32>
    %c0_5 = arith.constant 0 : index
    %c0_6 = arith.constant 0 : index
    %9 = vector.load %arg5[%c0_5, %c0_6] : memref<128x256xf32, #tpu.memory_space<vmem>>, vector<128x256xf32>
    %cst_7 = arith.constant dense<0.000000e+00> : vector<1x256xf32>
    %10 = tpu.matmul %6, %9, %cst_7 {dimension_numbers = #tpu.dot_dimension_numbers<[1], [0], [0], [1], [0, 0, 1, 1], [], []>} : vector<1x128xf32>, vector<128x256xf32>, vector<1x256xf32> -> vector<1x256xf32>
    %c0_8 = arith.constant 0 : index
    %c0_9 = arith.constant 0 : index
    %11 = vector.load %arg6[%c0_8, %c0_9] : memref<1x256xf32, #tpu.memory_space<vmem>>, vector<1x256xf32>
    %12 = arith.addf %10, %11 : vector<1x256xf32>
    %c0_10 = arith.constant 0 : index
    %c0_11 = arith.constant 0 : index
    %c0_12 = arith.constant 0 : index
    %13 = vector.load %arg4[%c0_10, %c0_11, %c0_12] : memref<2x32x128xf32, #tpu.memory_space<vmem>>, vector<1x32x128xf32>
    %14 = vector.shape_cast %13 : vector<1x32x128xf32> to vector<32x128xf32>
    %cst_13 = arith.constant dense<0.000000e+00> : vector<1x128xf32>
    %15 = tpu.matmul %8, %14, %cst_13 {dimension_numbers = #tpu.dot_dimension_numbers<[1], [0], [0], [1], [0, 0, 1, 1], [], []>} : vector<1x32xf32>, vector<32x128xf32>, vector<1x128xf32> -> vector<1x128xf32>
    %16 = vector.extract_strided_slice %12 {offsets = [0, 0], sizes = [1, 128], strides = [1, 1]} : vector<1x256xf32> to vector<1x128xf32>
    %17 = arith.addf %15, %16 : vector<1x128xf32>
    %18 = vector.extract_strided_slice %17 {offsets = [0, 0], sizes = [1, 96], strides = [1, 1]} : vector<1x128xf32> to vector<1x96xf32>
    %19 = arith.negf %18 : vector<1x96xf32>
    %20 = math.exp %19 : vector<1x96xf32>
    %cst_14 = arith.constant 1.000000e+00 : f32
    %21 = vector.broadcast %cst_14 : f32 to vector<1x96xf32>
    %22 = arith.addf %21, %20 : vector<1x96xf32>
    %23 = arith.divf %21, %22 : vector<1x96xf32>
    %24 = vector.extract_strided_slice %23 {offsets = [0, 0], sizes = [1, 32], strides = [1, 1]} : vector<1x96xf32> to vector<1x32xf32>
    %25 = vector.extract_strided_slice %23 {offsets = [0, 32], sizes = [1, 32], strides = [1, 1]} : vector<1x96xf32> to vector<1x32xf32>
    %26 = vector.extract_strided_slice %23 {offsets = [0, 64], sizes = [1, 32], strides = [1, 1]} : vector<1x96xf32> to vector<1x32xf32>
    %27 = vector.extract_strided_slice %17 {offsets = [0, 96], sizes = [1, 32], strides = [1, 1]} : vector<1x128xf32> to vector<1x32xf32>
    %28 = math.tanh %27 : vector<1x32xf32>
    %29 = arith.mulf %25, %7 : vector<1x32xf32>
    %30 = arith.mulf %24, %28 : vector<1x32xf32>
    %31 = arith.addf %29, %30 : vector<1x32xf32>
    %32 = math.tanh %31 : vector<1x32xf32>
    %33 = arith.mulf %26, %32 : vector<1x32xf32>
    %c1 = arith.constant 1 : index
    %c0_15 = arith.constant 0 : index
    %c0_16 = arith.constant 0 : index
    %34 = vector.load %arg4[%c1, %c0_15, %c0_16] : memref<2x32x128xf32, #tpu.memory_space<vmem>>, vector<1x32x128xf32>
    %35 = vector.shape_cast %34 : vector<1x32x128xf32> to vector<32x128xf32>
    %cst_17 = arith.constant dense<0.000000e+00> : vector<1x128xf32>
    %36 = tpu.matmul %33, %35, %cst_17 {dimension_numbers = #tpu.dot_dimension_numbers<[1], [0], [0], [1], [0, 0, 1, 1], [], []>} : vector<1x32xf32>, vector<32x128xf32>, vector<1x128xf32> -> vector<1x128xf32>
    %37 = vector.extract_strided_slice %12 {offsets = [0, 128], sizes = [1, 128], strides = [1, 1]} : vector<1x256xf32> to vector<1x128xf32>
    %38 = arith.addf %36, %37 : vector<1x128xf32>
    %39 = vector.extract_strided_slice %38 {offsets = [0, 0], sizes = [1, 96], strides = [1, 1]} : vector<1x128xf32> to vector<1x96xf32>
    %40 = arith.negf %39 : vector<1x96xf32>
    %41 = math.exp %40 : vector<1x96xf32>
    %cst_18 = arith.constant 1.000000e+00 : f32
    %42 = vector.broadcast %cst_18 : f32 to vector<1x96xf32>
    %43 = arith.addf %42, %41 : vector<1x96xf32>
    %44 = arith.divf %42, %43 : vector<1x96xf32>
    %45 = vector.extract_strided_slice %44 {offsets = [0, 0], sizes = [1, 32], strides = [1, 1]} : vector<1x96xf32> to vector<1x32xf32>
    %46 = vector.extract_strided_slice %44 {offsets = [0, 32], sizes = [1, 32], strides = [1, 1]} : vector<1x96xf32> to vector<1x32xf32>
    %47 = vector.extract_strided_slice %44 {offsets = [0, 64], sizes = [1, 32], strides = [1, 1]} : vector<1x96xf32> to vector<1x32xf32>
    %48 = vector.extract_strided_slice %38 {offsets = [0, 96], sizes = [1, 32], strides = [1, 1]} : vector<1x128xf32> to vector<1x32xf32>
    %49 = math.tanh %48 : vector<1x32xf32>
    %50 = arith.mulf %46, %7 : vector<1x32xf32>
    %51 = arith.mulf %45, %49 : vector<1x32xf32>
    %52 = arith.addf %50, %51 : vector<1x32xf32>
    %53 = math.tanh %52 : vector<1x32xf32>
    %54 = arith.mulf %47, %53 : vector<1x32xf32>
    %55 = tpu.concatenate %33, %54, %31, %52 in 1 : vector<1x32xf32>, vector<1x32xf32>, vector<1x32xf32>, vector<1x32xf32> -> vector<1x128xf32>
    %c0_19 = arith.constant 0 : index
    %c0_20 = arith.constant 0 : index
    %56 = vector.load %arg12[%c0_19, %c0_20] : memref<1x128xf32, #tpu.memory_space<vmem>>, vector<1x128xf32>
    tpu.vector_store %arg12[%c0_19, %c0_20], %55 {strides = array<i32>} : memref<1x128xf32, #tpu.memory_space<vmem>>, vector<1x128xf32>,
    %c0_21 = arith.constant 0 : index
    %c0_22 = arith.constant 0 : index
    %57 = vector.load %arg7[%c0_21, %c0_22] : memref<32x64xf32, #tpu.memory_space<vmem>>, vector<32x64xf32>
    %cst_23 = arith.constant dense<0.000000e+00> : vector<1x64xf32>
    %58 = tpu.matmul %54, %57, %cst_23 {dimension_numbers = #tpu.dot_dimension_numbers<[1], [0], [0], [1], [0, 0, 1, 1], [], []>} : vector<1x32xf32>, vector<32x64xf32>, vector<1x64xf32> -> vector<1x64xf32>
    %c0_24 = arith.constant 0 : index
    %c0_25 = arith.constant 0 : index
    %59 = vector.load %arg8[%c0_24, %c0_25] : memref<1x64xf32, #tpu.memory_space<vmem>>, vector<1x64xf32>
    %60 = arith.addf %58, %59 : vector<1x64xf32>
    %cst_26 = arith.constant 0.000000e+00 : f32
    %61 = vector.broadcast %cst_26 : f32 to vector<1x64xf32>
    %62 = arith.maximumf %60, %61 : vector<1x64xf32>
    %c0_27 = arith.constant 0 : index
    %c0_28 = arith.constant 0 : index
    %63 = vector.load %arg9[%c0_27, %c0_28] : memref<64x1664xf32, #tpu.memory_space<vmem>>, vector<64x1664xf32>
    %cst_29 = arith.constant dense<0.000000e+00> : vector<1x1664xf32>
    %64 = tpu.matmul %62, %63, %cst_29 {dimension_numbers = #tpu.dot_dimension_numbers<[1], [0], [0], [1], [0, 0, 1, 1], [], []>} : vector<1x64xf32>, vector<64x1664xf32>, vector<1x1664xf32> -> vector<1x1664xf32>
    %c0_30 = arith.constant 0 : index
    %c0_31 = arith.constant 0 : index
    %65 = vector.load %arg10[%c0_30, %c0_31] : memref<1x1664xf32, #tpu.memory_space<vmem>>, vector<1x1664xf32>
    %66 = arith.addf %64, %65 : vector<1x1664xf32>
    %c0_32 = arith.constant 0 : index
    %c0_33 = arith.constant 0 : index
    %67 = vector.load %arg11[%c0_32, %c0_33] : memref<1x1664xf32, #tpu.memory_space<vmem>>, vector<1x1664xf32>
    tpu.vector_store %arg11[%c0_32, %c0_33], %66 {strides = array<i32>} : memref<1x1664xf32, #tpu.memory_space<vmem>>, vector<1x1664xf32>,
    %68 = vector.extract_strided_slice %66 {offsets = [0, 0], sizes = [1, 256], strides = [1, 1]} : vector<1x1664xf32> to vector<1x256xf32>
    %c0_34 = arith.constant 0 : index
    %c0_35 = arith.constant 0 : index
    %69 = vector.load %arg14[%c0_34, %c0_35] : memref<4x256xf32, #tpu.memory_space<vmem>>, vector<1x256xf32>
    tpu.vector_store %arg14[%c0_34, %c0_35], %68 {strides = array<i32>} : memref<4x256xf32, #tpu.memory_space<vmem>>, vector<1x256xf32>,
    %70 = vector.extract_strided_slice %66 {offsets = [0, 256], sizes = [1, 256], strides = [1, 1]} : vector<1x1664xf32> to vector<1x256xf32>
    %c1_36 = arith.constant 1 : index
    %c0_37 = arith.constant 0 : index
    %71 = vector.load %arg14[%c1_36, %c0_37] : memref<4x256xf32, #tpu.memory_space<vmem>>, vector<1x256xf32>
    tpu.vector_store %arg14[%c1_36, %c0_37], %70 {strides = array<i32>} : memref<4x256xf32, #tpu.memory_space<vmem>>, vector<1x256xf32>,
    %72 = vector.extract_strided_slice %66 {offsets = [0, 512], sizes = [1, 256], strides = [1, 1]} : vector<1x1664xf32> to vector<1x256xf32>
    %c2 = arith.constant 2 : index
    %c0_38 = arith.constant 0 : index
    %73 = vector.load %arg14[%c2, %c0_38] : memref<4x256xf32, #tpu.memory_space<vmem>>, vector<1x256xf32>
    tpu.vector_store %arg14[%c2, %c0_38], %72 {strides = array<i32>} : memref<4x256xf32, #tpu.memory_space<vmem>>, vector<1x256xf32>,
    %74 = vector.extract_strided_slice %66 {offsets = [0, 768], sizes = [1, 256], strides = [1, 1]} : vector<1x1664xf32> to vector<1x256xf32>
    %c3 = arith.constant 3 : index
    %c0_39 = arith.constant 0 : index
    %75 = vector.load %arg14[%c3, %c0_39] : memref<4x256xf32, #tpu.memory_space<vmem>>, vector<1x256xf32>
    tpu.vector_store %arg14[%c3, %c0_39], %74 {strides = array<i32>} : memref<4x256xf32, #tpu.memory_space<vmem>>, vector<1x256xf32>,
    %76 = vector.extract_strided_slice %66 {offsets = [0, 1280], sizes = [1, 256], strides = [1, 1]} : vector<1x1664xf32> to vector<1x256xf32>
    %c0_40 = arith.constant 0 : index
    %c0_41 = arith.constant 0 : index
    %77 = vector.load %arg0[%c0_40, %c0_41] : memref<8x4xf32, #tpu.memory_space<vmem>>, vector<8x4xf32>
    %c0_42 = arith.constant 0 : index
    %c0_43 = arith.constant 0 : index
    %78 = vector.load %arg14[%c0_42, %c0_43] : memref<4x256xf32, #tpu.memory_space<vmem>>, vector<4x256xf32>
    %cst_44 = arith.constant dense<0.000000e+00> : vector<8x256xf32>
    %79 = tpu.matmul %77, %78, %cst_44 {dimension_numbers = #tpu.dot_dimension_numbers<[1], [0], [0], [1], [0, 0, 1, 1], [], []>} : vector<8x4xf32>, vector<4x256xf32>, vector<8x256xf32> -> vector<8x256xf32>
    %80 = vector.broadcast %76 : vector<1x256xf32> to vector<8x256xf32>
    %81 = arith.addf %79, %80 : vector<8x256xf32>
    %cst_45 = arith.constant 0.000000e+00 : f32
    %82 = vector.broadcast %cst_45 : f32 to vector<8x256xf32>
    %83 = arith.maximumf %81, %82 : vector<8x256xf32>
    %84 = vector.extract_strided_slice %66 {offsets = [0, 1024], sizes = [1, 256], strides = [1, 1]} : vector<1x1664xf32> to vector<1x256xf32>
    %85 = vector.extract_strided_slice %66 {offsets = [0, 1536], sizes = [1, 1], strides = [1, 1]} : vector<1x1664xf32> to vector<1x1xf32>
    %86 = vector.broadcast %84 : vector<1x256xf32> to vector<8x256xf32>
    %87 = arith.mulf %83, %86 : vector<8x256xf32>
    %cst_46 = arith.constant dense<0.000000e+00> : vector<8xf32>
    %88 = vector.multi_reduction <add>, %87, %cst_46 [1] : vector<8x256xf32> to vector<8xf32>
    %89 = vector.shape_cast %88 : vector<8xf32> to vector<8x1xf32>
    %90 = vector.broadcast %85 : vector<1x1xf32> to vector<8x1xf32>
    %91 = arith.addf %89, %90 : vector<8x1xf32>
    %92 = arith.negf %91 : vector<8x1xf32>
    %93 = math.exp %92 : vector<8x1xf32>
    %cst_47 = arith.constant 1.000000e+00 : f32
    %94 = vector.broadcast %cst_47 : f32 to vector<8x1xf32>
    %95 = arith.addf %94, %93 : vector<8x1xf32>
    %96 = arith.divf %94, %95 : vector<8x1xf32>
    %c0_48 = arith.constant 0 : index
    %c0_49 = arith.constant 0 : index
    %97 = vector.load %arg13[%c0_48, %c0_49] : memref<8x1xf32, #tpu.memory_space<vmem>>, vector<8x1xf32>
    tpu.vector_store %arg13[%c0_48, %c0_49], %96 {strides = array<i32>} : memref<8x1xf32, #tpu.memory_space<vmem>>, vector<8x1xf32>,
    return
  }
}

</mosaic_0001>

<bundles_post_ra>
// kernel: rnn_forward.1
= control target key start
LH: loop header
LB: loop body
LE: loop exit
PB: predicated region body
PF: predicated region fallthrough
CT: control target
= control target key end

     0   :  { %19 = vsyncpa [#allocation4], 0  ;;  %s2539_s0 = inlined_call_operand.vmem [shape: f32[8,4], index: 0, kind: input, shape index: {}]   ;;  %s2540_s1 = inlined_call_operand.vmem [shape: f32[1,32], index: 1, kind: input, shape index: {}]   ;;  %s2541_s2 = inlined_call_operand.hbm [shape: f32[32,384], index: 2, kind: input, shape index: {}]   ;;  %s2542_s3 = inlined_call_operand.hbm [shape: f32[1,384], index: 3, kind: input, shape index: {}]   ;;  %s2543_s4 = inlined_call_operand.hbm [shape: f32[2,32,128], index: 4, kind: input, shape index: {}]   ;;  %s2544_s5 = inlined_call_operand.hbm [shape: f32[128,256], index: 5, kind: input, shape index: {}]   ;;  %s2545_s6 = inlined_call_operand.vmem [shape: f32[1,256], index: 6, kind: input, shape index: {}]   ;;  %s2546_s7 = inlined_call_operand.hbm [shape: f32[32,64], index: 7, kind: input, shape index: {}]   ;;  %s2547_s8 = inlined_call_operand.hbm [shape: f32[1,64], index: 8, kind: input, shape index: {}]   ;;  %s2548_s9 = inlined_call_operand.hbm [shape: f32[64,1664], index: 9, kind: input, shape index: {}]   ;;  %s2549_s10 = inlined_call_operand.vmem [shape: f32[1,1664], index: 10, kind: input, shape index: {}]   ;;  %s2550_s11 = inlined_call_operand.vmem [shape: f32[1,1664], index: 11, kind: output, shape index: {0}]   ;;  %s2551_s12 = inlined_call_operand.vmem [shape: f32[1,128], index: 12, kind: output, shape index: {1}]   ;;  %s2552_s13 = inlined_call_operand.vmem [shape: f32[8,1], index: 13, kind: output, shape index: {2}]  }
   0x1   :  { %20 = vsyncpa [#allocation6], 0 }
   0x2   :  { %21 = vsyncpa [#allocation9], 0 }
   0x3   :  { %22 = vsyncpa [#allocation12], 0  ;;  %s2184_s25 = smov [#allocation5]   ;;  %s2185_s27 = smov [#allocation8]  }
   0x4   :  { %s45_s26 = sshll.u32 %s2184_s25, 4  ;;  %s66_s28 = sshll.u32 %s2185_s27, 4  ;;  %s46_s26 = int_to_ptr.vmem [resolvable:$true] %s45_s26  ;;  %s2276_s28 = int_to_ptr.vmem [resolvable:$true] %s66_s28 }
   0x5   :  { %s2022_s14 = scalar_lea.hbm %s2542_s3, 48 }
   0x6   :  { %p2023_p0 = scmp.ne.s32.totalorder %s2542_s3, %s2022_s14  ;;  %p2026_p1 = scmp.lt.u32.totalorder %s2022_s14, %s2542_s3 }
   0x8   :  { %p2028_p2 = pnand %p2026_p1, %p2023_p0 }
   0xa   :  { %2031 = shalt.err (!%p2028_p2)
}
   0xb   :  { %s2032_s19 = scalar_lea.vmem %s46_s26, 48  ;;  %s2036_s20 = scalar_lea.vmem %s46_s26, 64 }
   0xc   :  { %p2033_p3 = scmp.ne.s32.totalorder %s46_s26, %s2032_s19  ;;  %p2037_p4 = scmp.lt.s32.totalorder %s46_s26, %s46_s26 }
   0xd   :  { %p2038_p5 = scmp.lt.s32.totalorder %s2036_s20, %s2032_s19 }
   0xf   :  { %p2039_p6 = por %p2038_p5, %p2037_p4 }
  0x11   :  { %p2040_p7 = pnand %p2039_p6, %p2033_p3 }
  0x13   :  { %2043 = shalt.err (!%p2040_p7)
}
  0x14   :  { %48 = dma.hbm_to_vmem [thread:$0]  %s2542_s3, 48, %s46_s26, [#allocation6]  }
  0x15   :  { %s2044_s25 = scalar_lea.hbm %s2544_s5, 4096 }
  0x16   :  { %p2045_p8 = scmp.ne.s32.totalorder %s2544_s5, %s2044_s25  ;;  %p2048_p9 = scmp.lt.u32.totalorder %s2044_s25, %s2544_s5 }
  0x18   :  { %p2050_p10 = pnand %p2048_p9, %p2045_p8 }
  0x1a   :  { %2053 = shalt.err (!%p2050_p10)
}
  0x1b   :  { %s2054_s15 = scalar_lea.vmem %s2276_s28, 4096  ;;  %p2059_p12 = scmp.lt.s32.totalorder %s2276_s28, %s2276_s28 }
  0x1c   :  { %p2055_p11 = scmp.ne.s32.totalorder %s2276_s28, %s2054_s15  ;;  %p2060_p13 = scmp.lt.s32.totalorder %s2054_s15, %s2054_s15 }
  0x1e   :  { %p2061_p0 = por %p2060_p13, %p2059_p12 }
  0x20   :  { %p2062_p1 = pnand %p2061_p0, %p2055_p11 }
  0x22   :  { %2065 = shalt.err (!%p2062_p1)
}
  0x23   :  { %s2186_s3 = smov 256   ;;  %s2187_s26 = smov 16  }
  0x24   :  { %72 = dma.hbm_to_vmem [thread:$0]  %s2544_s5, 4096, %s2276_s28, [#allocation9], %s2186_s3, %s2186_s3, %s2187_s26  }
  0x25   :  { %s2188_s18 = smov [#allocation11]   ;;  %s2189_s20 = smov [#allocation3]  }
  0x26   :  { %s93_s19 = sshll.u32 %s2188_s18, 4  ;;  %s32_s21 = sshll.u32 %s2189_s20, 4  ;;  %s94_s19 = int_to_ptr.vmem [resolvable:$true] %s93_s19  ;;  %s2307_s21 = int_to_ptr.vmem [resolvable:$true] %s32_s21 }
  0x27   :  { %s2066_s24 = scalar_lea.hbm %s2547_s8, 16 }
  0x28   :  { %p2067_p2 = scmp.ne.s32.totalorder %s2547_s8, %s2066_s24  ;;  %p2070_p3 = scmp.lt.u32.totalorder %s2066_s24, %s2547_s8 }
  0x2a   :  { %p2072_p4 = pnand %p2070_p3, %p2067_p2 }
  0x2c   :  { %2075 = shalt.err (!%p2072_p4)
}
  0x2d   :  { %s2076_s5 = scalar_lea.vmem %s94_s19, 16  ;;  %s2080_s28 = scalar_lea.vmem %s94_s19, 32 }
  0x2e   :  { %p2077_p5 = scmp.ne.s32.totalorder %s94_s19, %s2076_s5  ;;  %p2081_p6 = scmp.lt.s32.totalorder %s94_s19, %s94_s19 }
  0x2f   :  { %p2082_p7 = scmp.lt.s32.totalorder %s2080_s28, %s2076_s5 }
  0x31   :  { %p2083_p8 = por %p2082_p7, %p2081_p6 }
  0x33   :  { %p2084_p9 = pnand %p2083_p8, %p2077_p5 }
  0x35   :  { %2087 = shalt.err (!%p2084_p9)
}
  0x36   :  { %96 = dma.hbm_to_vmem [thread:$0]  %s2547_s8, 16, %s94_s19, [#allocation12]  }
  0x37   :  { %s2088_s16 = scalar_lea.hbm %s2541_s2, 1536 }
  0x38   :  { %p2089_p10 = scmp.ne.s32.totalorder %s2541_s2, %s2088_s16  ;;  %p2092_p11 = scmp.lt.u32.totalorder %s2088_s16, %s2541_s2 }
  0x3a   :  { %p2094_p12 = pnand %p2092_p11, %p2089_p10 }
  0x3c   :  { %2097 = shalt.err (!%p2094_p12)
}
  0x3d   :  { %s2098_s23 = scalar_lea.vmem %s2307_s21, 1536  ;;  %p2103_p0 = scmp.lt.s32.totalorder %s2307_s21, %s2307_s21 }
  0x3e   :  { %p2099_p13 = scmp.ne.s32.totalorder %s2307_s21, %s2098_s23  ;;  %p2104_p1 = scmp.lt.s32.totalorder %s2098_s23, %s2098_s23 }
  0x40   :  { %p2105_p2 = por %p2104_p1, %p2103_p0 }
  0x42   :  { %p2106_p3 = pnand %p2105_p2, %p2099_p13 }
  0x44   :  { %2109 = shalt.err (!%p2106_p3)
}
  0x45   :  { %s2190_s8 = smov 384   ;;  %s2191_s19 = smov 24  }
  0x46   :  { %38 = dma.hbm_to_vmem [thread:$0]  %s2541_s2, 1536, %s2307_s21, [#allocation4], %s2190_s8, %s2190_s8, %s2191_s19  }
  0x47   :  { %s2192_s27 = smov [#allocation7]   ;;  %s2110_s28 = scalar_lea.hbm %s2543_s4, 1024 }
  0x48   :  { %s54_s29 = sshll.u32 %s2192_s27, 4  ;;  %p2111_p4 = scmp.ne.s32.totalorder %s2543_s4, %s2110_s28  ;;  %s55_s29 = int_to_ptr.vmem [resolvable:$true] %s54_s29 }
  0x49   :  { %p2114_p5 = scmp.lt.u32.totalorder %s2110_s28, %s2543_s4 }
  0x4b   :  { %p2116_p6 = pnand %p2114_p5, %p2111_p4 }
  0x4d   :  { %2119 = shalt.err (!%p2116_p6)
}
  0x4e   :  { %s2120_s16 = scalar_lea.vmem %s55_s29, 1024  ;;  %p2125_p8 = scmp.lt.s32.totalorder %s55_s29, %s55_s29 }
  0x4f   :  { %p2121_p7 = scmp.ne.s32.totalorder %s55_s29, %s2120_s16  ;;  %p2126_p9 = scmp.lt.s32.totalorder %s2120_s16, %s2120_s16 }
  0x51   :  { %p2127_p10 = por %p2126_p9, %p2125_p8 }
  0x53   :  { %p2128_p11 = pnand %p2127_p10, %p2121_p7 }
  0x55   :  { %2131 = shalt.err (!%p2128_p11)
}
  0x56   :  { %s2193_s2 = smov 128   ;;  %s2194_s21 = smov 8  }
  0x57   :  { %60 = dma.hbm_to_vmem [thread:$0]  %s2543_s4, 1024, %s55_s29, [#allocation6], %s2193_s2, %s2193_s2, %s2194_s21  }
  0x58   :  { %s2195_s20 = smov [#allocation10]   ;;  %s2196_s23 = smov [#allocation13]  }
  0x59   :  { %s80_s22 = sshll.u32 %s2195_s20, 4  ;;  %s102_s8 = sshll.u32 %s2196_s23, 4  ;;  %s81_s22 = int_to_ptr.vmem [resolvable:$true] %s80_s22  ;;  %s103_s8 = int_to_ptr.vmem [resolvable:$true] %s102_s8 }
  0x5a   :  { %s2132_s25 = scalar_lea.hbm %s2546_s7, 512 }
  0x5b   :  { %p2133_p12 = scmp.ne.s32.totalorder %s2546_s7, %s2132_s25  ;;  %p2136_p13 = scmp.lt.u32.totalorder %s2132_s25, %s2546_s7 }
  0x5d   :  { %p2138_p0 = pnand %p2136_p13, %p2133_p12 }
  0x5f   :  { %2141 = shalt.err (!%p2138_p0)
}
  0x60   :  { %s2142_s4 = scalar_lea.vmem %s81_s22, 512  ;;  %p2147_p2 = scmp.lt.s32.totalorder %s81_s22, %s81_s22 }
  0x61   :  { %p2143_p1 = scmp.ne.s32.totalorder %s81_s22, %s2142_s4  ;;  %p2148_p3 = scmp.lt.s32.totalorder %s2142_s4, %s2142_s4 }
  0x63   :  { %p2149_p4 = por %p2148_p3, %p2147_p2 }
  0x65   :  { %p2150_p5 = pnand %p2149_p4, %p2143_p1 }
  0x67   :  { %2153 = shalt.err (!%p2150_p5)
}
  0x68   :  { %86 = dma.hbm_to_vmem [thread:$0]  %s2546_s7, 512, %s81_s22, [#allocation9], %s2193_s2, %s2193_s2, %s2194_s21  }
  0x69   :  { %s2154_s26 = scalar_lea.hbm %s2548_s9, 13312 }
  0x6a   :  { %p2155_p6 = scmp.ne.s32.totalorder %s2548_s9, %s2154_s26  ;;  %p2158_p7 = scmp.lt.u32.totalorder %s2154_s26, %s2548_s9 }
  0x6c   :  { %p2160_p8 = pnand %p2158_p7, %p2155_p6 }
  0x6e   :  { %2163 = shalt.err (!%p2160_p8)
}
  0x6f   :  { %s2164_s23 = scalar_lea.vmem %s103_s8, 13312  ;;  %p2169_p10 = scmp.lt.s32.totalorder %s103_s8, %s103_s8 }
  0x70   :  { %p2165_p9 = scmp.ne.s32.totalorder %s103_s8, %s2164_s23  ;;  %p2170_p11 = scmp.lt.s32.totalorder %s2164_s23, %s2164_s23 }
  0x72   :  { %p2171_p12 = por %p2170_p11, %p2169_p10 }
  0x74   :  { %p2172_p13 = pnand %p2171_p12, %p2165_p9 }
  0x76   :  { %2175 = shalt.err (!%p2172_p13)
}
  0x77   :  { %s2197_s7 = smov 1664   ;;  %s2198_s2 = smov 104  }
  0x78   :  { %108 = dma.hbm_to_vmem [thread:$0]  %s2548_s9, 13312, %s103_s8, [#allocation12], %s2197_s7, %s2197_s7, %s2198_s2  }
  0x79   :  { %2176 = dma.done.wait [#allocation4], 1536  }
  0x7a   :  { %2177 = vsyncadd [#allocation4], 4294965760 }
  0x7b   :  { %2178 = dma.done.wait [#allocation6], 1072  }
  0x7c   :  { %2179 = vsyncadd [#allocation6], 4294966224 }
  0x7d   :  { %2180 = dma.done.wait [#allocation9], 4608  }
  0x7e   :  { %2181 = vsyncadd [#allocation9], 4294962688 }
  0x7f   :  { %2182 = dma.done.wait [#allocation12], 13328  }
  0x80   :  { %2183 = vsyncadd [#allocation12], 4294953968  ;;  %v2199_v0 = vmov 0.0|0.0   ;;  %v2200_v1 = vmov 0.0   ;;  %vm2201_vm0 = vmmov 0   ;;  %v134_v2 = vld [vmem:[#allocation3 + $0x8] sm:$0xff] }
  0x81   :  { %1809 = vmatprep.subr.bf16.mxu1 %v2199_v0  ;;  %230 = vmatprep.mubr.f32.mxu0 %v2200_v1  ;;  %v137_v3 = vld [vmem:[#allocation3 + $0x20] sm:$0xff]  ;;  %v136_v6 = vld [vmem:[#allocation3 + $0x18] sm:$0xff]  ;;  %v135_v7 = vld [vmem:[#allocation3 + $0x10] sm:$0xff]  ;;  %vm162_vm1 = vcmask 261120   ;;  %s2202_s24 = smov 32   ;;  %s2204_s25 = smov 96  }
  0x82   :  { %1746 = vmatprep.mubr.msk.f32.mxu1 %vm2201_vm0, %v2200_v1  ;;  %v133_v4 = vld [vmem:[#allocation3] sm:$0xff]  ;;  %v1801_v5 = vpack.c.bf16 %v137_v3, %v134_v2  ;;  %v138_v8 = vld [vmem:[#allocation3 + $0x28] sm:$0xff]  ;;  %v140_v11 = vld [vmem:[#allocation3 + $0x38] sm:$0xff]  ;;  %vm648_vm2 = vcmask 523264   ;;  %vm650_vm3 = vcmask 785408   ;;  %vm1571_vm5 = vcmask 1043456  }
  0x83   :  { %v1803_v9 = vpack.c.bf16 %v136_v6, %v133_v4  ;;  %v1810_v10 = vpack.c.bf16 %v138_v8, %v135_v7  ;;  %v143_v12 = vld [vmem:[#allocation3 + $0x50] sm:$0xff]  ;;  %v142_v15 = vld [vmem:[#allocation3 + $0x48] sm:$0xff]  ;;  %v141_v16 = vld [vmem:[#allocation3 + $0x40] sm:$0xff]  ;;  %vm1567_vm6 = vcmask 31744   ;;  %vm1673_vm8 = vcmask 7168  }
  0x84   :  { %v139_v13 = vld [vmem:[#allocation3 + $0x30] sm:$0xff]  ;;  %1802 = vmatprep.subr.bf16.mxu0 %v1801_v5  ;;  %v1805_v14 = vpack.c.bf16 %v143_v12, %v140_v11  ;;  %v144_v17 = vld [vmem:[#allocation3 + $0x58] sm:$0xff]  ;;  %v310_v23 = vld [vmem:[#allocation8] sm:$0xff] }
  0x85   :  { %1804 = vmatpush1.bf16.msra.mxu0 %v1803_v9  ;;  %1811 = vmatpush3.bf16.msra.mxu1 %v1810_v10  ;;  %v1807_v18 = vpack.c.bf16 %v142_v15, %v139_v13  ;;  %v1813_v19 = vpack.c.bf16 %v144_v17, %v141_v16  ;;  %v311_v20 = vld [vmem:[#allocation8 + $0x8] sm:$0xff]  ;;  %v313_v21 = vld [vmem:[#allocation8 + $0x18] sm:$0xff]  ;;  %v312_v24 = vld [vmem:[#allocation8 + $0x10] sm:$0xff]  ;;  %v147_v13 = vlaneseq }
  0x86   :  { %1806 = vmatprep.subr.bf16.mxu0 %v1805_v14  ;;  %1812 = vmatprep.subr.bf16.mxu1 %v2199_v0  ;;  %v1815_v22 = vpack.c.bf16 %v313_v21, %v311_v20  ;;  %v315_v25 = vld [vmem:[#allocation8 + $0x28] sm:$0xff]  ;;  %v317_v26 = vld [vmem:[#allocation8 + $0x38] sm:$0xff]  ;;  %v132_v27 = vld [vmem:[%s2540_s1] sm:$0x1]  ;;  %v1817_v28 = vpack.c.bf16 %v312_v24, %v310_v23 }
  0x87   :  { %v1819_v29 = vpack.c.bf16 %v317_v26, %v315_v25  ;;  %v314_v30 = vld [vmem:[#allocation8 + $0x20] sm:$0xff]  ;;  %v316_v31 = vld [vmem:[#allocation8 + $0x30] sm:$0xff]  ;;  %v319_v32 = vld [vmem:[#allocation8 + $0x48] sm:$0xff]  ;;  %v2391_v14 = vshrl.u32 %v147_v13, 7  ;;  %vm2486_vm4 = vcmp.lt.s32.totalorder %v147_v13, 256  ;;  %vm1511_vm7 = vcmp.lt.s32.totalorder %v147_v13, 640 }
  0x88   :  { %v321_v33 = vld [vmem:[#allocation8 + $0x58] sm:$0xff]  ;;  %v1821_v34 = vpack.c.bf16 %v316_v31, %v314_v30  ;;  %v318_v36 = vld [vmem:[#allocation8 + $0x40] sm:$0xff]  ;;  %v320_v37 = vld [vmem:[#allocation8 + $0x50] sm:$0xff] }
  0x89   :  { %1808 = vmatpush1.bf16.msra.mxu0 %v1807_v18  ;;  %1814 = vmatpush3.bf16.msra.mxu1 %v1813_v19  ;;  %v1823_v35 = vpack.c.bf16 %v321_v33, %v319_v32  ;;  %v323_v38 = vld [vmem:[#allocation8 + $0x68] sm:$0xff]  ;;  %v325_v39 = vld [vmem:[#allocation8 + $0x78] sm:$0xff]  ;;  %v1825_v40 = vpack.c.bf16 %v320_v37, %v318_v36  ;;  %v322_v42 = vld [vmem:[#allocation8 + $0x60] sm:$0xff]  ;;  %v2394_v15 = vsub.s32 0, %v2391_v14  ;;  %v2397_v16 = vsub.s32 2, %v2391_v14 }
  0x8a   :  { %1816 = vmatprep.subr.bf16.mxu0 %v1815_v22  ;;  %1847 = vmatprep.subr.bf16.mxu1 %v2199_v0  ;;  %v1827_v41 = vpack.c.bf16 %v325_v39, %v323_v38  ;;  %v324_v43 = vld [vmem:[#allocation8 + $0x70] sm:$0xff]  ;;  %v327_v44 = vld [vmem:[#allocation8 + $0x88] sm:$0xff]  ;;  %v329_v45 = vld [vmem:[#allocation8 + $0x98] sm:$0xff] }
  0x8b   :  { %v1829_v46 = vpack.c.bf16 %v324_v43, %v322_v42  ;;  %v1831_v47 = vpack.c.bf16 %v329_v45, %v327_v44  ;;  %v326_v48 = vld [vmem:[#allocation8 + $0x80] sm:$0xff]  ;;  %v328_v49 = vld [vmem:[#allocation8 + $0x90] sm:$0xff]  ;;  %v331_v51 = vld [vmem:[#allocation8 + $0xa8] sm:$0xff] }
  0x8c   :  { %1691 = vmatmul.mubr.msk.f32.vlgmr.msra.gmra.mrb[0].mxu0 %vm162_vm1, %v132_v27  ;;  %1747 = vmatmul.mubr.msk.f32.vlgmr.msra.gmra.mrb[0].mxu1 %vm162_vm1, %v132_v27  ;;  %v1833_v50 = vpack.c.bf16 %v328_v49, %v326_v48  ;;  %v333_v52 = vld [vmem:[#allocation8 + $0xb8] sm:$0xff]  ;;  %v330_v54 = vld [vmem:[#allocation8 + $0xa0] sm:$0xff]  ;;  %v332_v55 = vld [vmem:[#allocation8 + $0xb0] sm:$0xff] }
  0x8d   :  { %1818 = vmatpush1.bf16.msra.mxu0 %v1817_v28  ;;  %418 = vmatprep.mubr.f32.mxu0 %v2200_v1  ;;  %v1835_v53 = vpack.c.bf16 %v333_v52, %v331_v51  ;;  %v1837_v56 = vpack.c.bf16 %v332_v55, %v330_v54  ;;  %v335_v57 = vld [vmem:[#allocation8 + $0xc8] sm:$0xff]  ;;  %v337_v58 = vld [vmem:[#allocation8 + $0xd8] sm:$0xff]  ;;  %v334_v60 = vld [vmem:[#allocation8 + $0xc0] sm:$0xff] }
  0x8e   :  { %1820 = vmatprep.subr.bf16.mxu0 %v1819_v29  ;;  %1757 = vmatprep.mubr.msk.f32.mxu1 %vm2201_vm0, %v2200_v1  ;;  %v1839_v59 = vpack.c.bf16 %v337_v58, %v335_v57  ;;  %v336_v61 = vld [vmem:[#allocation8 + $0xd0] sm:$0xff]  ;;  %v425_v62 = vld [vmem:[#allocation7] sm:$0xff]  ;;  %v426_v2 = vld [vmem:[#allocation7 + $0x8] sm:$0xff]  ;;  %v2409_v29 = vsub.s32 1, %v2391_v14 }
  0x8f   :  { %v1841_v63 = vpack.c.bf16 %v336_v61, %v334_v60  ;;  %v339_v3 = vld [vmem:[#allocation8 + $0xe8] sm:$0xff]  ;;  %v341_v4 = vld [vmem:[#allocation8 + $0xf8] sm:$0xff]  ;;  %v1848_v5 = vpack.c.bf16 %v426_v2, %v425_v62  ;;  %v338_v7 = vld [vmem:[#allocation8 + $0xe0] sm:$0xff] }
  0x90   :  { %v1843_v6 = vpack.c.bf16 %v341_v4, %v339_v3  ;;  %v340_v8 = vld [vmem:[#allocation8 + $0xf0] sm:$0xff]  ;;  %v428_v11 = vld [vmem:[#allocation7 + $0x18] sm:$0xff]  ;;  %v531_v51 = vld [vmem:[#allocation7 + $0x20] sm:$0xff] }
  0x91   :  { %1822 = vmatpush1.bf16.msra.mxu0 %v1821_v34  ;;  %v427_v9 = vld [vmem:[#allocation7 + $0x10] sm:$0xff]  ;;  %v1845_v10 = vpack.c.bf16 %v340_v8, %v338_v7  ;;  %1849 = vmatpush3.bf16.msra.mxu1 %v1848_v5  ;;  %v145_v17 = vld [vmem:[#allocation5] sm:$0x7]  ;;  %v532_v52 = vld [vmem:[#allocation7 + $0x28] sm:$0xff] }
  0x92   :  { %1824 = vmatprep.subr.bf16.mxu0 %v1823_v35  ;;  %v1851_v12 = vpack.c.bf16 %v428_v11, %v427_v9  ;;  %1850 = vmatprep.subr.bf16.mxu1 %v2199_v0  ;;  %v150_v18 = vrot.slane %v145_v17, %v2394_v15  ;;  %v158_v19 = vrot.slane %v145_v17, %v2397_v16  ;;  %v342_v28 = vld [vmem:[%s2545_s6] sm:$0x3]  ;;  %v534_v55 = vld [vmem:[#allocation7 + $0x38] sm:$0xff]  ;;  %s2203_s6 = smov 64  }
  0x93   :  { %v347_v30 = vrot.slane %v342_v28, %v2394_v15  ;;  %v154_v32 = vrot.slane %v145_v17, %v2409_v29  ;;  %v1854_v54 = vpack.c.bf16 %v532_v52, %v531_v51  ;;  %v351_v61 = vrot.slane %v342_v28, %v2409_v29  ;;  %v747_v28 = vld [vmem:[#allocation13 + $0x70] sm:$0xff]  ;;  %v746_v51 = vld [vmem:[#allocation13 + $0x68] sm:$0xff]  ;;  %v760_v52 = vld [vmem:[#allocation13 + $0xd8] sm:$0xff] }
  0x95   :  { %1826 = vmatpush1.bf16.msra.mxu0 %v1825_v40  ;;  %1852 = vmatpush3.bf16.msra.mxu1 %v1851_v12 }
  0x96   :  { %1828 = vmatprep.subr.bf16.mxu0 %v1827_v41  ;;  %1853 = vmatprep.subr.bf16.mxu1 %v2199_v0 }
  0x99   :  { %1830 = vmatpush1.bf16.msra.mxu0 %v1829_v46 }
  0x9a   :  { %1832 = vmatprep.subr.bf16.mxu0 %v1831_v47 }
  0x9d   :  { %1834 = vmatpush1.bf16.msra.mxu0 %v1833_v50 }
  0x9e   :  { %1836 = vmatprep.subr.bf16.mxu0 %v1835_v53  ;;  %v533_v53 = vld [vmem:[#allocation7 + $0x30] sm:$0xff] }
  0xa1   :  { %1838 = vmatpush1.bf16.msra.mxu0 %v1837_v56  ;;  %v1857_v56 = vpack.c.bf16 %v534_v55, %v533_v53  ;;  %v773_v53 = vld [vmem:[#allocation13 + $0x140] sm:$0xff] }
  0xa2   :  { %1840 = vmatprep.subr.bf16.mxu0 %v1839_v59  ;;  %v1869_v55 = vpack.c.bf16 %v773_v53, %v760_v52  ;;  %v765_v52 = vld [vmem:[#allocation13 + $0x100] sm:$0xff]  ;;  %v778_v53 = vld [vmem:[#allocation13 + $0x168] sm:$0xff] }
  0xa5   :  { %1842 = vmatpush1.bf16.msra.mxu0 %v1841_v63 }
  0xa6   :  { %1844 = vmatprep.subr.bf16.mxu0 %v1843_v6 }
  0xa9   :  { %1846 = vmatpush1.bf16.msra.mxu0 %v1845_v10 }
 0x15f   :  { %v232_v20 = vpop.f32.mrb[0].mxu0  ;;  %v303_v21 = vpop.f32.mrb[0].mxu1 }
 0x160   :  { %v233_v22 = vadd.f32 %v232_v20, %v150_v18  ;;  %v234_v23 = vpop.f32.mrb[1].mxu0  ;;  %v304_v24 = vadd.f32 %v303_v21, %v158_v19  ;;  %v1748_v25 = vpop.f32.mrb[1].mxu1  ;;  %v653_v19 = vld [vmem:[#allocation10] sm:$0xff]  ;;  %v654_v20 = vld [vmem:[#allocation10 + $0x8] sm:$0xff]  ;;  %v655_v21 = vld [vmem:[#allocation10 + $0x10] sm:$0xff] }
 0x161   :  { %v235_v38 = vadd.f32 %v234_v23, %v154_v32  ;;  %v656_v23 = vld [vmem:[#allocation10 + $0x18] sm:$0xff]  ;;  %v749_v32 = vld [vmem:[#allocation13 + $0x80] sm:$0xff] }
 0x162   :  { %1996 = vtanh.f32 %v233_v22  ;;  %v1860_v22 = vpack.c.bf16 %v654_v20, %v653_v19  ;;  %v811_v19 = vld [vmem:[#allocation13 + $0x270] sm:$0xff]  ;;  %v824_v20 = vld [vmem:[#allocation13 + $0x2d8] sm:$0xff] }
 0x163   :  { %1998 = vtanh.f32 %v304_v24  ;;  %v1863_v24 = vpack.c.bf16 %v656_v23, %v655_v21  ;;  %v813_v23 = vld [vmem:[#allocation13 + $0x280] sm:$0xff] }
 0x16c   :  { %v1997_v26 = vpop.eup %1996 }
 0x16d   :  { %419 = vmatmul.mubr.f32.vlgmr.msra.gmra.mrb[2].mxu0 %v1997_v26  ;;  %v1999_v27 = vpop.eup %1998 }
 0x16e   :  { %1044 = vmatprep.mubr.f32.mxu0 %v2200_v1  ;;  %1758 = vmatmul.mubr.msk.f32.vlgmr.msra.gmra.mrb[2].mxu1 %vm162_vm1, %v1999_v27  ;;  %v734_v27 = vld [vmem:[#allocation13 + $0x8] sm:$0xff] }
 0x16f   :  { %1768 = vmatprep.mubr.msk.f32.mxu1 %vm2201_vm0, %v2200_v1  ;;  %1855 = vmatpush3.bf16.msra.mxu1 %v1854_v54 }
 0x170   :  { %1856 = vmatprep.subr.bf16.mxu1 %v2199_v0 }
 0x173   :  { %1858 = vmatpush3.bf16.msra.mxu1 %v1857_v56  ;;  %v759_v56 = vld [vmem:[#allocation13 + $0xd0] sm:$0xff] }
 0x174   :  { %1859 = vmatprep.subr.bf16.mxu1 %v2199_v0 }
 0x240   :  { %v420_v31 = vpop.f32.mrb[2].mxu0 }
 0x241   :  { %v421_v33 = vadd.f32 %v420_v31, %v347_v30  ;;  %v422_v34 = vpop.f32.mrb[3].mxu0  ;;  %v498_v35 = vpop.f32.mrb[2].mxu1  ;;  %v736_v30 = vld [vmem:[#allocation13 + $0x18] sm:$0xff]  ;;  %v1865_v31 = vpack.c.bf16 %v747_v28, %v734_v27 }
 0x242   :  { %v1759_v37 = vpop.f32.mrb[3].mxu1  ;;  %v423_v62 = vadd.f32 %v422_v34, %v351_v61  ;;  %v735_v34 = vld [vmem:[#allocation13 + $0x10] sm:$0xff]  ;;  %v740_v27 = vld [vmem:[#allocation13 + $0x38] sm:$0xff] }
 0x243   :  { %v499_v36 = vadd.f32 %v498_v35, %v421_v33  ;;  %v1881_v33 = vpack.c.bf16 %v749_v32, %v736_v30  ;;  %v748_v35 = vld [vmem:[#allocation13 + $0x78] sm:$0xff]  ;;  %v762_v37 = vld [vmem:[#allocation13 + $0xe8] sm:$0xff]  ;;  %v799_v61 = vld [vmem:[#allocation13 + $0x210] sm:$0xff] }
 0x244   :  { %v753_v30 = vld [vmem:[#allocation13 + $0xa0] sm:$0xff]  ;;  %v657_v32 = vld [vmem:[#allocation11] sm:$0x1] }
 0x245   :  { %2000 = vtanh.f32 %v499_v36  ;;  %v1694_v41 = vmul.f32 -1.442695, %v499_v36  ;;  %v1883_v36 = vpack.c.bf16 %v748_v35, %v735_v34  ;;  %1882 = vmatprep.subr.bf16.mxu0 %v1881_v33  ;;  %v737_v33 = vld [vmem:[#allocation13 + $0x20] sm:$0xff]  ;;  %v750_v34 = vld [vmem:[#allocation13 + $0x88] sm:$0xff]  ;;  %v739_v35 = vld [vmem:[#allocation13 + $0x30] sm:$0xff] }
 0x246   :  { %2002 = vtanh.f32 %v235_v38  ;;  %v775_v38 = vld [vmem:[#allocation13 + $0x150] sm:$0xff] }
 0x247   :  { %2004 = vpow2.f32 %v1694_v41  ;;  %1884 = vmatpush1.bf16.msra.mxu0 %v1883_v36  ;;  %v774_v41 = vld [vmem:[#allocation13 + $0x148] sm:$0xff]  ;;  %v752_v36 = vld [vmem:[#allocation13 + $0x98] sm:$0xff] }
 0x24f   :  { %v2001_v39 = vpop.eup %2000 }
 0x250   :  { %515 = vrot.lane.b32.xlu0 %v2001_v39, %s2202_s24  ;;  %v2003_v40 = vpop.eup %2002  ;;  %v1885_v39 = vpack.c.bf16 %v775_v38, %v762_v37  ;;  %v764_v37 = vld [vmem:[#allocation13 + $0xf8] sm:$0xff] }
 0x251   :  { %v2005_v42 = vpop.eup %2004 }
 0x252   :  { %v505_v43 = vadd.f32 1.0, %v2005_v42  ;;  %1886 = vmatprep.subr.bf16.mxu0 %v1885_v39  ;;  %v777_v39 = vld [vmem:[#allocation13 + $0x160] sm:$0xff] }
 0x254   :  { %510 = vrot.lane.b32.xlu0 %v2003_v40, %s2202_s24  ;;  %2006 = vrcp.f32 %v505_v43  ;;  %v761_v40 = vld [vmem:[#allocation13 + $0xe0] sm:$0xff]  ;;  %v788_v43 = vld [vmem:[#allocation13 + $0x1b8] sm:$0xff] }
 0x255   :  { %v1887_v42 = vpack.c.bf16 %v774_v41, %v761_v40  ;;  %v766_v40 = vld [vmem:[#allocation13 + $0x108] sm:$0xff]  ;;  %v779_v41 = vld [vmem:[#allocation13 + $0x170] sm:$0xff] }
 0x257   :  { %1888 = vmatpush1.bf16.msra.mxu0 %v1887_v42 }
 0x25e   :  { %v2007_v44 = vpop.eup %2006 }
 0x2c2   :  { %v516_v45 = vpop.permute.xlu0 %515 }
 0x2c3   :  { %v518_v46 = vmul.f32 %v2007_v44, %v516_v45 }
 0x2c5   :  { %520 = vrot.lane.b32.xlu1 %v518_v46, %s2202_s24  ;;  %v787_v46 = vld [vmem:[#allocation13 + $0x1b0] sm:$0xff] }
 0x2c6   :  { %v511_v47 = vpop.permute.xlu0 %510 }
 0x2c7   :  { %v513_v48 = vmul.f32 %v2007_v44, %v511_v47 }
 0x337   :  { %v521_v49 = vpop.permute.xlu1 %520 }
 0x338   :  { %v2416_v50 = vadd.f32 %v521_v49, %v513_v48  ;;  %v733_v49 = vld [vmem:[#allocation13] sm:$0xff] }
 0x339   :  { %v1867_v54 = vpack.c.bf16 %v746_v51, %v733_v49  ;;  %v1901_v49 = vpack.c.bf16 %v777_v39, %v764_v37  ;;  %v1917_v51 = vpack.c.bf16 %v779_v41, %v766_v40  ;;  %v780_v39 = vld [vmem:[#allocation13 + $0x178] sm:$0xff] }
 0x33a   :  { %2008 = vtanh.f32 %v2416_v50 }
 0x344   :  { %v2009_v57 = vpop.eup %2008 }
 0x345   :  { %526 = vrot.lane.b32.xlu1 %v2009_v57, %s2202_s24  ;;  %v772_v57 = vld [vmem:[#allocation13 + $0x138] sm:$0xff] }
 0x3b7   :  { %v527_v58 = vpop.permute.xlu1 %526 }
 0x3b8   :  { %v529_v59 = vmul.f32 %v2007_v44, %v527_v58  ;;  %v801_v44 = vld [vmem:[#allocation13 + $0x220] sm:$0xff] }
 0x3b9   :  { %v1889_v45 = vpack.c.bf16 %v801_v44, %v788_v43  ;;  %v1899_v44 = vpack.c.bf16 %v750_v34, %v737_v33  ;;  %v781_v33 = vld [vmem:[#allocation13 + $0x180] sm:$0xff]  ;;  %v770_v34 = vld [vmem:[#allocation13 + $0x128] sm:$0xff] }
 0x3ba   :  { %536 = vrot.lane.b32.xlu0 %v529_v59, %s2203_s6  ;;  %v786_v59 = vld [vmem:[#allocation13 + $0x1a8] sm:$0xff] }
 0x3bb   :  { %1890 = vmatprep.subr.bf16.mxu0 %v1889_v45  ;;  %v1915_v45 = vpack.c.bf16 %v752_v36, %v739_v35  ;;  %v783_v35 = vld [vmem:[#allocation13 + $0x190] sm:$0xff] }
 0x3bc   :  { %v1949_v41 = vpack.c.bf16 %v783_v35, %v770_v34 }
 0x42c   :  { %v2423_v60 = vpop.permute.xlu0 %536 }
 0x42d   :  { %1769 = vmatmul.mubr.msk.f32.vlgmr.msra.gmra.mrb[4].mxu1 %vm162_vm1, %v2423_v60 }
 0x42e   :  { %1779 = vmatprep.mubr.msk.f32.mxu1 %vm2201_vm0, %v2200_v1  ;;  %1861 = vmatpush3.bf16.msra.mxu1 %v1860_v22  ;;  %v1879_v22 = vpack.c.bf16 %v824_v20, %v811_v19  ;;  %v830_v19 = vld [vmem:[#allocation13 + $0x308] sm:$0xff] }
 0x42f   :  { %1862 = vmatprep.subr.bf16.mxu1 %v2199_v0  ;;  %v742_v20 = vld [vmem:[#allocation13 + $0x48] sm:$0xff] }
 0x432   :  { %1864 = vmatpush3.bf16.msra.mxu1 %v1863_v24  ;;  %v826_v24 = vld [vmem:[#allocation13 + $0x2e8] sm:$0xff] }
 0x433   :  { %1866 = vmatprep.subr.bf16.mxu1 %v1865_v31  ;;  %v1913_v31 = vpack.c.bf16 %v753_v30, %v740_v27  ;;  %v743_v30 = vld [vmem:[#allocation13 + $0x50] sm:$0xff] }
 0x500   :  { %v606_v63 = vpop.f32.mrb[4].mxu1 }
 0x501   :  { %v607_v2 = vadd.f32 %v606_v63, %v423_v62  ;;  %v1770_v3 = vpop.f32.mrb[5].mxu1  ;;  %v1873_v62 = vpack.c.bf16 %v799_v61, %v786_v59  ;;  %v785_v63 = vld [vmem:[#allocation13 + $0x1a0] sm:$0xff]  ;;  %v1919_v59 = vpack.c.bf16 %v778_v53, %v765_v52  ;;  %v806_v53 = vld [vmem:[#allocation13 + $0x248] sm:$0xff] }
 0x502   :  { %v789_v61 = vld [vmem:[#allocation13 + $0x1c0] sm:$0xff] }
 0x503   :  { %2010 = vtanh.f32 %v607_v2  ;;  %v1696_v5 = vmul.f32 -1.442695, %v607_v2  ;;  %v798_v2 = vld [vmem:[#allocation13 + $0x208] sm:$0xff]  ;;  %v793_v52 = vld [vmem:[#allocation13 + $0x1e0] sm:$0xff] }
 0x505   :  { %2012 = vpow2.f32 %v1696_v5 }
 0x50d   :  { %v2011_v4 = vpop.eup %2010 }
 0x50e   :  { %619 = vrot.lane.b32.xlu1 %v2011_v4, %s2202_s24  ;;  %v1875_v4 = vpack.c.bf16 %v798_v2, %v785_v63  ;;  %v791_v2 = vld [vmem:[#allocation13 + $0x1d0] sm:$0xff] }
 0x50f   :  { %v2013_v6 = vpop.eup %2012 }
 0x510   :  { %v613_v7 = vadd.f32 1.0, %v2013_v6 }
 0x512   :  { %2014 = vrcp.f32 %v613_v7 }
 0x51c   :  { %v2015_v8 = vpop.eup %2014 }
 0x51d   :  { %v617_v11 = vmul.f32 %v2015_v8, %v511_v47  ;;  %v800_v47 = vld [vmem:[#allocation13 + $0x218] sm:$0xff] }
 0x51e   :  { %v1891_v48 = vpack.c.bf16 %v800_v47, %v787_v46  ;;  %v763_v46 = vld [vmem:[#allocation13 + $0xf0] sm:$0xff]  ;;  %v776_v47 = vld [vmem:[#allocation13 + $0x158] sm:$0xff] }
 0x520   :  { %1892 = vmatpush1.bf16.msra.mxu0 %v1891_v48 }
 0x580   :  { %v620_v9 = vpop.permute.xlu1 %619 }
 0x581   :  { %v622_v10 = vmul.f32 %v2015_v8, %v620_v9 }
 0x583   :  { %624 = vrot.lane.b32.xlu0 %v622_v10, %s2202_s24  ;;  %v812_v10 = vld [vmem:[#allocation13 + $0x278] sm:$0xff] }
 0x5f5   :  { %v625_v12 = vpop.permute.xlu0 %624 }
 0x5f6   :  { %v627_v17 = vadd.f32 %v625_v12, %v617_v11  ;;  %v825_v11 = vld [vmem:[#allocation13 + $0x2e0] sm:$0xff]  ;;  %v814_v12 = vld [vmem:[#allocation13 + $0x288] sm:$0xff] }
 0x5f8   :  { %2016 = vtanh.f32 %v627_v17 }
 0x602   :  { %v2017_v18 = vpop.eup %2016 }
 0x603   :  { %630 = vrot.lane.b32.xlu1 %v2017_v18, %s2202_s24  ;;  %v827_v18 = vld [vmem:[#allocation13 + $0x2f0] sm:$0xff] }
 0x604   :  { %v1893_v21 = vpack.c.bf16 %v827_v18, %v814_v12  ;;  %v817_v18 = vld [vmem:[#allocation13 + $0x2a0] sm:$0xff] }
 0x606   :  { %1894 = vmatprep.subr.bf16.mxu0 %v1893_v21  ;;  %v755_v21 = vld [vmem:[#allocation13 + $0xb0] sm:$0xff] }
 0x607   :  { %v1929_v27 = vpack.c.bf16 %v755_v21, %v742_v20  ;;  %v797_v20 = vld [vmem:[#allocation13 + $0x200] sm:$0xff]  ;;  %v810_v21 = vld [vmem:[#allocation13 + $0x268] sm:$0xff] }
 0x675   :  { %v631_v25 = vpop.permute.xlu1 %630 }
 0x676   :  { %v633_v26 = vmul.f32 %v2015_v8, %v631_v25  ;;  %v738_v25 = vld [vmem:[#allocation13 + $0x28] sm:$0xff] }
 0x678   :  { %658 = vrot.lane.b32.xlu0 %v633_v26, %s2203_s6 }
 0x67c   :  { %636 = vrot.lane.b32.xlu0 %v633_v26, %s2204_s25  ;;  %v751_v26 = vld [vmem:[#allocation13 + $0x90] sm:$0xff] }
 0x67d   :  { %v1897_v28 = vpack.c.bf16 %v751_v26, %v738_v25  ;;  %v741_v25 = vld [vmem:[#allocation13 + $0x40] sm:$0xff]  ;;  %v754_v26 = vld [vmem:[#allocation13 + $0xa8] sm:$0xff] }
 0x67e   :  { %v1931_v36 = vpack.c.bf16 %v754_v26, %v741_v25  ;;  %v837_v25 = vld [vmem:[%s2549_s10] sm:$0xff]  ;;  %v2205_v26 = vmov 1966171168  }
 0x680   :  { %640 = vrot.lane.b32.xlu0 %v2416_v50, %s2202_s24  ;;  %v1871_v50 = vpack.c.bf16 %v772_v57, %v759_v56  ;;  %v792_v56 = vld [vmem:[#allocation13 + $0x1d8] sm:$0xff]  ;;  %v805_v57 = vld [vmem:[#allocation13 + $0x240] sm:$0xff] }
 0x681   :  { %v1921_v63 = vpack.c.bf16 %v805_v57, %v792_v56  ;;  %v795_v56 = vld [vmem:[#allocation13 + $0x1f0] sm:$0xff]  ;;  %v808_v57 = vld [vmem:[#allocation13 + $0x258] sm:$0xff] }
 0x684   :  { %644 = vrot.lane.b32.xlu0 %v627_v17, %s2203_s6  ;;  %v1877_v17 = vpack.c.bf16 %v825_v11, %v812_v10  ;;  %v815_v10 = vld [vmem:[#allocation13 + $0x290] sm:$0xff]  ;;  %v828_v11 = vld [vmem:[#allocation13 + $0x2f8] sm:$0xff] }
 0x6ea   :  { %v659_v58 = vpop.permute.xlu0 %658 }
 0x6eb   :  { %1780 = vmatmul.mubr.msk.f32.vlgmr.msra.gmra.mrb[6].mxu1 %vm162_vm1, %v659_v58  ;;  %v1903_v58 = vpack.c.bf16 %v776_v47, %v763_v46  ;;  %v796_v46 = vld [vmem:[#allocation13 + $0x1f8] sm:$0xff]  ;;  %v809_v47 = vld [vmem:[#allocation13 + $0x260] sm:$0xff] }
 0x6ec   :  { %1868 = vmatpush1.bf16.msra.mxu1 %v1867_v54  ;;  %973 = vmatprep.mubr.f32.mxu1 %v2200_v1  ;;  %v790_v54 = vld [vmem:[#allocation13 + $0x1c8] sm:$0xff] }
 0x6ed   :  { %1870 = vmatprep.subr.bf16.mxu1 %v1869_v55  ;;  %v803_v55 = vld [vmem:[#allocation13 + $0x230] sm:$0xff] }
 0x6ee   :  { %v637_v3 = vpop.permute.xlu0 %636 }
 0x6ef   :  { %v647_v6 = vsel %vm162_vm1, %v2423_v60, %v637_v3  ;;  %v1895_v60 = vpack.c.bf16 %v826_v24, %v813_v23  ;;  %v804_v3 = vld [vmem:[#allocation13 + $0x238] sm:$0xff]  ;;  %v757_v23 = vld [vmem:[#allocation13 + $0xc0] sm:$0xff]  ;;  %v1911_v24 = vpack.c.bf16 %v828_v11, %v815_v10  ;;  %v758_v11 = vld [vmem:[#allocation13 + $0xc8] sm:$0xff] }
 0x6f0   :  { %1872 = vmatpush1.bf16.msra.mxu1 %v1871_v50  ;;  %v802_v50 = vld [vmem:[#allocation13 + $0x228] sm:$0xff]  ;;  %v745_v10 = vld [vmem:[#allocation13 + $0x60] sm:$0xff] }
 0x6f1   :  { %1874 = vmatprep.subr.bf16.mxu1 %v1873_v62  ;;  %1896 = vmatpush1.bf16.msra.mxu0 %v1895_v60  ;;  %v1905_v62 = vpack.c.bf16 %v803_v55, %v790_v54  ;;  %v1927_v60 = vpack.c.bf16 %v830_v19, %v817_v18  ;;  %v1953_v55 = vpack.c.bf16 %v809_v47, %v796_v46  ;;  %v784_v18 = vld [vmem:[#allocation13 + $0x198] sm:$0xff] }
 0x6f2   :  { %v641_v5 = vpop.permute.xlu0 %640  ;;  %1914 = vmatprep.subr.bf16.mxu0 %v1913_v31  ;;  %v756_v31 = vld [vmem:[#allocation13 + $0xb8] sm:$0xff] }
 0x6f3   :  { %v649_v7 = vsel %vm648_vm2, %v647_v6, %v641_v5  ;;  %v829_v5 = vld [vmem:[#allocation13 + $0x300] sm:$0xff]  ;;  %v818_v6 = vld [vmem:[#allocation13 + $0x2a8] sm:$0xff]  ;;  %v1947_v37 = vpack.c.bf16 %v756_v31, %v743_v30  ;;  %v852_v30 = vrot.slane %v837_v25, %v2397_v16  ;;  %v848_v31 = vrot.slane %v837_v25, %v2409_v29 }
 0x6f4   :  { %1876 = vmatpush1.bf16.msra.mxu1 %v1875_v4  ;;  %v816_v4 = vld [vmem:[#allocation13 + $0x298] sm:$0xff] }
 0x6f5   :  { %1878 = vmatprep.subr.bf16.mxu1 %v1877_v17  ;;  %v1909_v12 = vpack.c.bf16 %v829_v5, %v816_v4  ;;  %v832_v5 = vld [vmem:[#allocation13 + $0x318] sm:$0xff] }
 0x6f6   :  { %v645_v8 = vpop.permute.xlu0 %644 }
 0x6f7   :  { %v651_v9 = vsel %vm650_vm3, %v649_v7, %v645_v8  ;;  %v831_v7 = vld [vmem:[#allocation13 + $0x310] sm:$0xff]  ;;  %v1907_v8 = vpack.c.bf16 %v802_v50, %v789_v61  ;;  %v822_v61 = vld [vmem:[#allocation13 + $0x2c8] sm:$0xff] }
 0x6f8   :  { %652 = vst [vmem:[%s2551_s12] sm:$0x1] %v651_v9  ;;  %1880 = vmatpush1.bf16.msra.mxu1 %v1879_v22  ;;  %v1923_v9 = vpack.c.bf16 %v804_v3, %v791_v2  ;;  %v1925_v17 = vpack.c.bf16 %v831_v7, %v818_v6  ;;  %v744_v22 = vld [vmem:[#allocation13 + $0x58] sm:$0xff]  ;;  %v835_v50 = vld [vmem:[#allocation13 + $0x330] sm:$0xff]  ;;  %v821_v6 = vld [vmem:[#allocation13 + $0x2c0] sm:$0xff] }
 0x6f9   :  { %1898 = vmatprep.subr.bf16.mxu1 %v1897_v28  ;;  %v1945_v28 = vpack.c.bf16 %v757_v23, %v744_v22  ;;  %v819_v2 = vld [vmem:[#allocation13 + $0x2b0] sm:$0xff]  ;;  %v1957_v4 = vpack.c.bf16 %v835_v50, %v822_v61  ;;  %v834_v7 = vld [vmem:[#allocation13 + $0x328] sm:$0xff]  ;;  %v1968_v22 = vpack.c.bf16 %v810_v21, %v797_v20 }
 0x6fa   :  { %v823_v23 = vld [vmem:[#allocation13 + $0x2d0] sm:$0xff] }
 0x7be   :  { %v728_v38 = vpop.f32.mrb[6].mxu1 }
 0x7bf   :  { %v729_v42 = vadd.f32 %v728_v38, %v657_v32  ;;  %v1781_v43 = vpop.f32.mrb[7].mxu1  ;;  %v768_v32 = vld [vmem:[#allocation13 + $0x118] sm:$0xff]  ;;  %v767_v38 = vld [vmem:[#allocation13 + $0x110] sm:$0xff] }
 0x7c0   :  { %v1933_v40 = vpack.c.bf16 %v781_v33, %v768_v32  ;;  %v782_v43 = vld [vmem:[#allocation13 + $0x188] sm:$0xff] }
 0x7c1   :  { %v2446_v48 = vmax.f32 %v729_v42, 0.0  ;;  %v769_v42 = vld [vmem:[#allocation13 + $0x120] sm:$0xff] }
 0x7c3   :  { %1698 = vmatmul.mubr.msk.f32.vlgmr.msra.gmra.mrb[8].mxu1 %vm648_vm2, %v2446_v48  ;;  %1699 = vmatmul.mubr.msk.f32.vlgmr.msra.gmra.mrb[4].mxu0 %vm648_vm2, %v2446_v48 }
 0x7c4   :  { %1900 = vmatpush1.bf16.msra.mxu1 %v1899_v44  ;;  %1916 = vmatpush1.bf16.msra.mxu0 %v1915_v45  ;;  %v794_v44 = vld [vmem:[#allocation13 + $0x1e8] sm:$0xff]  ;;  %v807_v45 = vld [vmem:[#allocation13 + $0x250] sm:$0xff] }
 0x7c5   :  { %1902 = vmatprep.subr.bf16.mxu1 %v1901_v49  ;;  %1918 = vmatprep.subr.bf16.mxu0 %v1917_v51  ;;  %v1935_v49 = vpack.c.bf16 %v780_v39, %v767_v38  ;;  %v1951_v51 = vpack.c.bf16 %v782_v43, %v769_v42  ;;  %v1937_v54 = vpack.c.bf16 %v807_v45, %v794_v44 }
 0x7c6   :  { %1115 = vmatprep.mubr.f32.mxu1 %v2200_v1  ;;  %1186 = vmatprep.mubr.f32.mxu0 %v2200_v1 }
 0x7c8   :  { %1904 = vmatpush1.bf16.msra.mxu1 %v1903_v58  ;;  %1920 = vmatpush1.bf16.msra.mxu0 %v1919_v59  ;;  %v820_v58 = vld [vmem:[#allocation13 + $0x2b8] sm:$0xff]  ;;  %v833_v59 = vld [vmem:[#allocation13 + $0x320] sm:$0xff] }
 0x7c9   :  { %1906 = vmatprep.subr.bf16.mxu1 %v1905_v62  ;;  %1922 = vmatprep.subr.bf16.mxu0 %v1921_v63  ;;  %v1939_v62 = vpack.c.bf16 %v806_v53, %v793_v52  ;;  %v1955_v63 = vpack.c.bf16 %v808_v57, %v795_v56  ;;  %v1941_v3 = vpack.c.bf16 %v833_v59, %v820_v58  ;;  %v867_v52 = vsub.s32 6, %v2391_v14 }
 0x7ca   :  { %v863_v53 = vsub.s32 5, %v2391_v14 }
 0x7cb   :  { %v868_v56 = vrot.slane %v837_v25, %v867_v52 }
 0x7cc   :  { %1908 = vmatpush1.bf16.msra.mxu1 %v1907_v8  ;;  %1924 = vmatpush1.bf16.msra.mxu0 %v1923_v9  ;;  %v1943_v8 = vpack.c.bf16 %v832_v5, %v819_v2  ;;  %v1959_v9 = vpack.c.bf16 %v834_v7, %v821_v6  ;;  %v864_v57 = vrot.slane %v837_v25, %v863_v53 }
 0x7cd   :  { %1910 = vmatprep.subr.bf16.mxu1 %v1909_v12  ;;  %1926 = vmatprep.subr.bf16.mxu0 %v1925_v17  ;;  %v1962_v12 = vpack.c.bf16 %v758_v11, %v745_v10  ;;  %v771_v17 = vld [vmem:[#allocation13 + $0x130] sm:$0xff] }
 0x7ce   :  { %v1965_v19 = vpack.c.bf16 %v784_v18, %v771_v17  ;;  %v838_v17 = vld [vmem:[%s2549_s10 + $0x8] sm:$0x1f] }
 0x7cf   :  { %v884_v20 = vrot.slane %v838_v17, %v2397_v16  ;;  %v880_v21 = vrot.slane %v838_v17, %v2409_v29  ;;  %v1555_v16 = vld [vmem:[%s2539_s0] sm:$0xff] }
 0x7d0   :  { %1912 = vmatpush1.bf16.msra.mxu1 %v1911_v24  ;;  %1928 = vmatpush1.bf16.msra.mxu0 %v1927_v60  ;;  %v836_v24 = vld [vmem:[#allocation13 + $0x338] sm:$0xff] }
 0x7d1   :  { %1930 = vmatprep.subr.bf16.mxu1 %v1929_v27  ;;  %1946 = vmatprep.subr.bf16.mxu0 %v1945_v28  ;;  %v1971_v60 = vpack.c.bf16 %v836_v24, %v823_v23  ;;  %v855_v27 = vsub.s32 3, %v2391_v14  ;;  %v844_v28 = vrot.slane %v837_v25, %v2394_v15 }
 0x7d3   :  { %1700 = vmatmul.mubr.msk.f32.vlgmr.msra.gmra.mrb[10].mxu1 %vm648_vm2, %v2446_v48  ;;  %1701 = vmatmul.mubr.msk.f32.vlgmr.msra.gmra.mrb[6].mxu0 %vm648_vm2, %v2446_v48 }
 0x7d4   :  { %1932 = vmatpush1.bf16.msra.mxu1 %v1931_v36  ;;  %1948 = vmatpush1.bf16.msra.mxu0 %v1947_v37 }
 0x7d5   :  { %1934 = vmatprep.subr.bf16.mxu1 %v1933_v40  ;;  %1950 = vmatprep.subr.bf16.mxu0 %v1949_v41 }
 0x7d6   :  { %1257 = vmatprep.mubr.f32.mxu1 %v2200_v1  ;;  %1328 = vmatprep.mubr.f32.mxu0 %v2200_v1 }
 0x7d8   :  { %1936 = vmatpush1.bf16.msra.mxu1 %v1935_v49  ;;  %1952 = vmatpush1.bf16.msra.mxu0 %v1951_v51  ;;  %v859_v51 = vsub.s32 4, %v2391_v14 }
 0x7d9   :  { %1938 = vmatprep.subr.bf16.mxu1 %v1937_v54  ;;  %1954 = vmatprep.subr.bf16.mxu0 %v1953_v55  ;;  %v871_v54 = vsub.s32 7, %v2391_v14 }
 0x7da   :  { %v860_v55 = vrot.slane %v837_v25, %v859_v51 }
 0x7db   :  { %v872_v58 = vrot.slane %v837_v25, %v871_v54 }
 0x7dc   :  { %1940 = vmatpush1.bf16.msra.mxu1 %v1939_v62  ;;  %1956 = vmatpush1.bf16.msra.mxu0 %v1955_v63 }
 0x7dd   :  { %1942 = vmatprep.subr.bf16.mxu1 %v1941_v3  ;;  %1958 = vmatprep.subr.bf16.mxu0 %v1957_v4 }
 0x7e0   :  { %1944 = vmatpush1.bf16.msra.mxu1 %v1943_v8  ;;  %1960 = vmatpush1.bf16.msra.mxu0 %v1959_v9 }
 0x7e1   :  { %1961 = vmatprep.subr.bf16.mxu1 %v2199_v0 }
 0x7e3   :  { %1702 = vmatmul.mubr.msk.f32.vlgmr.msra.gmra.mrb[12].mxu1 %vm648_vm2, %v2446_v48  ;;  %1703 = vmatmul.mubr.msk.f32.vlgmr.msra.gmra.mrb[8].mxu0 %vm648_vm2, %v2446_v48 }
 0x7e4   :  { %1963 = vmatpush3.bf16.msra.mxu1 %v1962_v12  ;;  %1798 = vmatprep.mubr.msk.f32.mxu1 %vm2201_vm0, %v2200_v1 }
 0x7e5   :  { %1964 = vmatprep.subr.bf16.mxu1 %v2199_v0  ;;  %1640 = vmatprep.mubr.f32.mxu0 %v2200_v1  ;;  %v1423_v1 = vunpack.c.l.s4 %v2205_v26 }
 0x7e7   :  { %v1424_v32 = vunpack.c.0.s8 %v1423_v1 }
 0x7e8   :  { %1966 = vmatpush3.bf16.msra.mxu1 %v1965_v19  ;;  %v876_v19 = vrot.slane %v838_v17, %v2394_v15 }
 0x7e9   :  { %1967 = vmatprep.subr.bf16.mxu1 %v2199_v0  ;;  %v2481_v39 = vsub.s32 %v1424_v32, %v2391_v14 }
 0x7ec   :  { %1969 = vmatpush3.bf16.msra.mxu1 %v1968_v22  ;;  %v888_v22 = vrot.slane %v838_v17, %v855_v27 }
 0x7ed   :  { %1970 = vmatprep.subr.bf16.mxu1 %v2199_v0  ;;  %v856_v0 = vrot.slane %v837_v25, %v855_v27 }
 0x7f0   :  { %1972 = vmatpush3.bf16.msra.mxu1 %v1971_v60 }
 0x7f3   :  { %1799 = vmatmul.mubr.msk.f32.vlgmr.msra.gmra.mrb[14].mxu1 %vm648_vm2, %v2446_v48 }
 0x896   :  { %v975_v33 = vpop.f32.mrb[8].mxu1  ;;  %v1046_v34 = vpop.f32.mrb[4].mxu0 }
 0x897   :  { %v976_v35 = vadd.f32 %v975_v33, %v844_v28  ;;  %v1047_v48 = vadd.f32 %v1046_v34, %v852_v30  ;;  %v977_v36 = vpop.f32.mrb[9].mxu1  ;;  %v1048_v37 = vpop.f32.mrb[5].mxu0 }
 0x898   :  { %v978_v38 = vadd.f32 %v977_v36, %v848_v31  ;;  %v1049_v40 = vadd.f32 %v1048_v37, %v856_v0 }
 0x89a   :  { %v1418_v41 = vcombine.low %v976_v35, %v978_v38  ;;  %v1419_v42 = vcombine.low %v1047_v48, %v1049_v40  ;;  %v892_v35 = vrot.slane %v838_v17, %v859_v51 }
 0x89c   :  { %v1428_v43 = vrot.slane %v1418_v41, %v2481_v39  ;;  %v1435_v44 = vrot.slane %v1419_v42, %v2481_v39 }
 0x89e   :  { %v1520_v46 = vrot.slane %v1428_v43, %v2481_v39  ;;  %v1450_v47 = vcombine.low %v1428_v43, %v1435_v44  ;;  %v1531_v49 = vrot.slane %v1435_v44, %v2481_v39 }
 0x8a0   :  { %1524 = vst.msk [vmem:[#allocation2] ss:$4 sm:$0x3] %vm2486_vm4, %v1520_v46  ;;  %1534 = vst.msk [vmem:[#allocation2 + $0x1] ss:$4 sm:$0x3] %vm2486_vm4, %v1531_v49  ;;  %v1458_v11 = vrot.slane %v1450_v47, %v2481_v39 }
 0x8a6   :  { %v1117_v59 = vpop.f32.mrb[10].mxu1  ;;  %v1188_v61 = vpop.f32.mrb[6].mxu0 }
 0x8a7   :  { %v1118_v50 = vadd.f32 %v1117_v59, %v860_v55  ;;  %v1189_v62 = vadd.f32 %v1188_v61, %v868_v56  ;;  %v1119_v63 = vpop.f32.mrb[11].mxu1  ;;  %v1190_v2 = vpop.f32.mrb[7].mxu0 }
 0x8a8   :  { %v1120_v3 = vadd.f32 %v1119_v63, %v864_v57  ;;  %v1191_v4 = vadd.f32 %v1190_v2, %v872_v58 }
 0x8aa   :  { %v1420_v5 = vcombine.low %v1118_v50, %v1120_v3  ;;  %v1421_v6 = vcombine.low %v1189_v62, %v1191_v4 }
 0x8ac   :  { %v1442_v7 = vrot.slane %v1420_v5, %v2481_v39  ;;  %v1449_v8 = vrot.slane %v1421_v6, %v2481_v39 }
 0x8ae   :  { %v1541_v14 = vrot.slane %v1442_v7, %v2481_v39  ;;  %v1451_v9 = vcombine.low %v1442_v7, %v1449_v8  ;;  %v1551_v10 = vrot.slane %v1449_v8, %v2481_v39 }
 0x8b0   :  { %1544 = vst.msk [vmem:[#allocation2 + $0x2] ss:$4 sm:$0x3] %vm2486_vm4, %v1541_v14  ;;  %v1465_v12 = vrot.slane %v1451_v9, %v2481_v39  ;;  %1554 = vst.msk [vmem:[#allocation2 + $0x3] ss:$4 sm:$0x3] %vm2486_vm4, %v1551_v10 }
 0x8b2   :  { %v1466_v18 = vcombine.low %v1458_v11, %v1465_v12 }
 0x8b4   :  { %1508 = vst [vmem:[%s2550_s11] sm:$0xff] %v1466_v18 }
 0x8b6   :  { %v1259_v23 = vpop.f32.mrb[12].mxu1  ;;  %v1330_v24 = vpop.f32.mrb[8].mxu0 }
 0x8b7   :  { %v1260_v60 = vadd.f32 %v1259_v23, %v876_v19  ;;  %v1331_v25 = vadd.f32 %v1330_v24, %v884_v20  ;;  %v1261_v26 = vpop.f32.mrb[13].mxu1  ;;  %v1332_v1 = vpop.f32.mrb[9].mxu0  ;;  %v1556_v28 = vld [vmem:[#allocation2] sm:$0xff] }
 0x8b8   :  { %v1262_v30 = vadd.f32 %v1261_v26, %v880_v21  ;;  %v1333_v31 = vadd.f32 %v1332_v1, %v888_v22  ;;  %v1566_v32 = vcombine.high %v1556_v28, %v1556_v28 }
 0x8b9   :  { %v1560_v43 = vrot.slane %v1331_v25, %v2394_v15  ;;  %v1652_v51 = vrot.slane %v1260_v60, %v2394_v15 }
 0x8ba   :  { %v1467_v0 = vcombine.low %v1260_v60, %v1262_v30  ;;  %v1468_v33 = vcombine.low %v1331_v25, %v1333_v31  ;;  %1705 = vmatprep.subr.msk.mxu0 %vm1571_vm5, %v1566_v32  ;;  %v1564_v45 = vrot.slane %v1333_v31, %v2394_v15 }
 0x8bb   :  { %1706 = vmatpush1.msk.msra.mxu0 %vm1571_vm5, %v1556_v28 }
 0x8bc   :  { %v1475_v29 = vrot.slane %v1467_v0, %v2481_v39  ;;  %v1482_v27 = vrot.slane %v1468_v33, %v2481_v39  ;;  %1707 = vmatmul.mubr.msk.f32.vlgmr.msra.gmra.mrb[10].mxu0 %vm1567_vm6, %v1555_v16 }
 0x8be   :  { %v1490_v34 = vcombine.low %v1475_v29, %v1482_v27 }
 0x8c0   :  { %v1497_v40 = vrot.slane %v1490_v34, %v2481_v39 }
 0x8c6   :  { %v1401_v48 = vpop.f32.mrb[14].mxu1 }
 0x8c7   :  { %v1402_v36 = vadd.f32 %v1401_v48, %v892_v35  ;;  %v1800_v37 = vpop.f32.mrb[15].mxu1 }
 0x8c9   :  { %v1489_v38 = vrot.slane %v1402_v36, %v2481_v39  ;;  %v1665_v56 = vrot.slane %v1402_v36, %v2394_v15 }
 0x8cb   :  { %v1504_v41 = vrot.slane %v1489_v38, %v2481_v39  ;;  %v1656_v39 = vrot.slane %v1262_v30, %v2394_v15 }
 0x8cd   :  { %v1505_v42 = vcombine.low %v1497_v40, %v1504_v41 }
 0x8cf   :  { %1513 = vst.msk [vmem:[%s2550_s11 + $0x8] sm:$0x1f] %vm1511_vm7, %v1505_v42 }
 0x98f   :  { %v1642_v44 = vpop.f32.mrb[10].mxu0 }
 0x990   :  { %v1643_v46 = vadd.f32 %v1642_v44, %v1560_v43  ;;  %v1644_v47 = vpop.f32.mrb[11].mxu0 }
 0x991   :  { %v1645_v49 = vadd.f32 %v1644_v47, %v1564_v45 }
 0x992   :  { %v1647_v52 = vmax.f32 %v1643_v46, 0.0 }
 0x993   :  { %v1648_v53 = vmax.f32 %v1645_v49, 0.0 }
 0x994   :  { %v1657_v13 = vmul.f32 %v1652_v51, %v1647_v52 }
 0x995   :  { %v1658_v54 = vmul.f32 %v1656_v39, %v1648_v53 }
 0x997   :  { %v1659_v55 = vadd.f32 %v1658_v54, %v1657_v13 }
 0x999   :  { %1660 = vadd.xlane.f32.xlu1 %v1659_v55 }
 0xa26   :  { %v1661_v57 = vpop.xlane.xlu1 %1660 }
 0xa27   :  { %v1666_v58 = vadd.f32 %v1665_v56, %v1661_v57 }
 0xa29   :  { %v1708_v59 = vmul.f32 -1.442695, %v1666_v58 }
 0xa2b   :  { %2018 = vpow2.f32 %v1708_v59 }
 0xa35   :  { %v2019_v61 = vpop.eup %2018 }
 0xa36   :  { %v1670_v50 = vadd.f32 1.0, %v2019_v61 }
 0xa38   :  { %2020 = vrcp.f32 %v1670_v50 }
 0xa42   :  { %v2021_v62 = vpop.eup %2020 }
 0xa43   :  { %1674 = vst.msk [vmem:[%s2552_s13] sm:$0xff] %vm1673_vm8, %v2021_v62 }
 0xa44   :  { %1687 = vsyncpa [#allocation4], 1 }
 0xa45   :  { %1688 = vsyncpa [#allocation6], 1 }
 0xa46   :  { %1689 = vsyncpa [#allocation9], 1 }
 0xa47   :  { %1690 = vsyncpa [#allocation12], 1 }

</bundles_post_ra>
